<compile_context>
chip_gen: v6e
topology: v6e:2x2x1
jax: 0.10.0
libtpu: 0.0.40
codegen_flags: <defaults>
</compile_context>

<pallas_src>
import functools

import jax
import jax.numpy as jnp
from jax import lax
from jax.experimental import pallas as pl
from jax.experimental.pallas import tpu as pltpu


def _ru8(n):
    return (n + 7) // 8 * 8


# ----------------------------------------------------------------------------
# Fused Pallas kernel
# ----------------------------------------------------------------------------

def _fused_kernel(tok_ref, lstm_ref, head_ref, hc0_ref, out_ref,
                  *, B, T, H, V, L, f0_dim):
    """Fused embedding + merged bi-LSTM + (shape+mean) heads.

    tok_ref  : (T*B, 2) int32 -- row n=s*B+b: [sents[b,s], V + sents[b,T-1-s]]
    lstm_ref : (Vp+2H, 8H) f32 -- rows [0:Vp): folded input proj (fwd rows |
               bwd rows | bias row | pad); rows [Vp:Vp+2H): block-diag W_hh.
               Gate columns: [i | f | g | o], each 2H wide, fwd lanes first.
    head_ref : packed [W1 | b1 | W2(pad) | b2(pad)] slab, lane width L.
    hc0_ref  : (2, B, 2H) -- [0]=h0 [fwd|bwd], [1]=c0 [fwd|bwd]
    out_ref  : (B, T*f0)
    """
    N = T * B
    H2 = 2 * H
    Vp = _ru8(2 * V + 1)

    # ---- combined one-hot: fwd token | bwd token | bias column (== 2V) ----
    tok = tok_ref[...]                                         # (N, 2) int32
    col = lax.broadcasted_iota(jnp.int32, (N, Vp), 1)
    onehot = ((col == tok[:, 0:1]) | (col == tok[:, 1:2]) | (col == 2 * V)
              ).astype(jnp.float32)                            # (N, Vp)

    # ---- gate inputs for every combined step, both dirs, + bias: 1 MXU pass ----
    wih = lstm_ref[0:Vp, :]                                    # (Vp, 8H)
    gates_in = jnp.dot(onehot, wih, preferred_element_type=jnp.float32)  # (N, 8H)

    whh = lstm_ref[Vp:Vp + H2, :]                              # (2H, 8H) block-diag

    # ---- merged fwd/bwd recurrence: T steps, one matmul per step ----
    # step s: forward direction consumes time s, backward consumes time T-1-s
    h = hc0_ref[0]                                             # (B, 2H)
    c = hc0_ref[1]                                             # (B, 2H)
    hs = []
    for s in range(T):
        gates = gates_in[s * B:(s + 1) * B, :] + jnp.dot(
            h, whh, preferred_element_type=jnp.float32)        # (B, 8H)
        sig = jax.nn.sigmoid(gates)        # one EUP pass over all gates
        i = sig[:, 0 * H2:1 * H2]
        f = sig[:, 1 * H2:2 * H2]
        g = jnp.tanh(gates[:, 2 * H2:3 * H2])
        o = sig[:, 3 * H2:4 * H2]
        c = f * c + i * g                  # lane-aligned with the (B,2H) state
        h = o * jnp.tanh(c)
        hs.append(h)

    # per-time bidirectional hidden: fwd half from step t, bwd half from step T-1-t
    x = jnp.concatenate(
        [jnp.concatenate([hs[t][:, 0:H], hs[T - 1 - t][:, H:H2]], axis=1)
         for t in range(T)], axis=0)                           # (N, 2H), time-major

    # ---- fused shape+mean heads: 2 matmuls ----
    r_b1 = _ru8(H2)
    r_w2 = r_b1 + 8
    r_b2 = r_w2 + _ru8(L)
    w1 = head_ref[0:H2, :]                                     # (2H, L)
    b1 = head_ref[r_b1:r_b1 + 1, :]                            # (1, L)
    w2 = head_ref[r_w2:r_w2 + L, :]                            # (L, L) lane-padded
    b2 = head_ref[r_b2:r_b2 + 1, :]                            # (1, L) lane-padded

    h1 = jnp.maximum(jnp.dot(x, w1, preferred_element_type=jnp.float32) + b1, 0.0)
    y = jnp.dot(h1, w2, preferred_element_type=jnp.float32) + b2   # (N, L); cols>=f0 are 0

    # ---- single store of the final (B, T*f0) layout ----
    out_ref[...] = jnp.concatenate(
        [y[t * B:(t + 1) * B, 0:f0_dim] for t in range(T)], axis=1)


# ----------------------------------------------------------------------------
# Wrapper (weight prep + single pallas_call)
# ----------------------------------------------------------------------------

_VMEM = pl.BlockSpec(memory_space=pltpu.MemorySpace.VMEM)


def emb_mean_std_forward(sents, sent_length, params, h0, c0):
    """sents: (B, T) int32; sent_length: (B,) int32 (unused, as in the module)."""
    del sent_length  # unused by the reference forward()
    B, T = sents.shape
    V = params["embed"].shape[0]
    H = params["whh_f"].shape[0]
    H2 = 2 * H
    Ls = params["ws1"].shape[1]
    Lm = params["wm1"].shape[1]
    L = Ls + Lm
    f0_dim = params["ws2"].shape[1]
    Vp = _ru8(2 * V + 1)
    N = T * B
    f32 = jnp.float32

    # ---- fold embedding into the input projection (exact: one-hot rows) ----
    pf = params["embed"] @ params["wih_f"]            # (V, 4H)
    pb = params["embed"] @ params["wih_b"]            # (V, 4H)

    zV = jnp.zeros((V, H), f32)
    zH = jnp.zeros((H, H), f32)
    wih_cols, whh_cols, b_cols = [], [], []
    for k in range(4):                                # PyTorch gate order i, f, g, o
        sl = slice(k * H, (k + 1) * H)
        wih_cols += [jnp.concatenate([pf[:, sl], zV], axis=0),   # fwd-token rows
                     jnp.concatenate([zV, pb[:, sl]], axis=0)]   # bwd-token rows
        whh_cols += [jnp.concatenate([params["whh_f"][:, sl], zH], axis=0),
                     jnp.concatenate([zH, params["whh_b"][:, sl]], axis=0)]
        b_cols += [params["b_f"][:, sl], params["b_b"][:, sl]]
    wih2 = jnp.concatenate(wih_cols, axis=1)          # (2V, 8H)
    whh2 = jnp.concatenate(whh_cols, axis=1)          # (2H, 8H) block-diagonal
    bias_row = jnp.concatenate(b_cols, axis=1)        # (1, 8H)

    pad = jnp.zeros((Vp - 2 * V - 1, 8 * H), f32)
    lstm_slab = jnp.concatenate([wih2, bias_row, pad, whh2], axis=0)   # (Vp+2H, 8H)

    # ---- fused head weights, packed in one lane-padded slab ----
    w1c = jnp.concatenate([params["ws1"], params["wm1"]], axis=1)      # (2H, L)
    b1c = jnp.concatenate([params["bs1"], params["bm1"]], axis=1)      # (1, L)
    w2c = jnp.concatenate(
        [params["ws2"], jnp.tile(params["wm2"], (1, f0_dim))], axis=0)  # (L, f0)
    b2c = params["bs2"] + params["bm2"]                                 # (1, f0)

    def lane_pad(x):
        if x.shape[1] >= L:
            return x
        return jnp.concatenate([x, jnp.zeros((x.shape[0], L - x.shape[1]), f32)], axis=1)

    def row_pad8(x):
        r = (-x.shape[0]) % 8
        if r == 0:
            return x
        return jnp.concatenate([x, jnp.zeros((r, x.shape[1]), f32)], axis=0)

    head_slab = jnp.concatenate(
        [row_pad8(w1c), row_pad8(b1c), row_pad8(lane_pad(w2c)), row_pad8(lane_pad(b2c))],
        axis=0)                                                         # (112, L) here

    # ---- combined per-step token ids: fwd time s, bwd time T-1-s ----
    tok_f = jnp.transpose(sents).reshape(N, 1)
    tok_b = jnp.transpose(sents[:, ::-1]).reshape(N, 1) + V
    tok = jnp.concatenate([tok_f, tok_b], axis=1).astype(jnp.int32)     # (N, 2)

    # ---- initial state, direction lane-concatenated ----
    hc0 = jnp.stack([jnp.concatenate([h0[0], h0[1]], axis=1),
                     jnp.concatenate([c0[0], c0[1]], axis=1)]).astype(f32)  # (2, B, 2H)

    kernel = functools.partial(_fused_kernel, B=B, T=T, H=H, V=V, L=L, f0_dim=f0_dim)

    out = pl.pallas_call(
        kernel,
        out_shape=jax.ShapeDtypeStruct((B, T * f0_dim), f32),
        in_specs=[_VMEM] * 4,
        out_specs=_VMEM,
    )(tok, lstm_slab.astype(f32), head_slab.astype(f32), hc0)

    # already h.view(batch, max_length * f0_dim)
    return out


# ----------------------------------------------------------------------------
# Deterministic parameter construction (matches __init__ shapes / init ranges)
# ----------------------------------------------------------------------------

def make_params(key, *, emb_size, voc_size, hidden, f0_dim,
                linear_shape, linear_mean):
    ks = jax.random.split(key, 24)
    k = iter(ks)
    H = hidden
    lstm_bound = 1.0 / jnp.sqrt(jnp.float32(H))   # PyTorch LSTM default init

    def u(kk, shape, a, b):
        return jax.random.uniform(kk, shape, jnp.float32, a, b)

    params = {
        # nn.Embedding(voc_size, emb_size); init.uniform(-0.01, 0.01)
        "embed": u(next(k), (voc_size, emb_size), -0.01, 0.01),
        # shape_lstm weights, stored transposed (in, 4H) for x @ W layout;
        # biases are b_ih + b_hh combined.
        "wih_f": u(next(k), (emb_size, 4 * H), -lstm_bound, lstm_bound),
        "whh_f": u(next(k), (H, 4 * H), -lstm_bound, lstm_bound),
        "b_f": (u(next(k), (1, 4 * H), -lstm_bound, lstm_bound)
                + u(next(k), (1, 4 * H), -lstm_bound, lstm_bound)),
        "wih_b": u(next(k), (emb_size, 4 * H), -lstm_bound, lstm_bound),
        "whh_b": u(next(k), (H, 4 * H), -lstm_bound, lstm_bound),
        "b_b": (u(next(k), (1, 4 * H), -lstm_bound, lstm_bound)
                + u(next(k), (1, 4 * H), -lstm_bound, lstm_bound)),
        # Linear layers: weight/bias ~ U(-1, 1); stored transposed (in, out).
        "ws1": u(next(k), (2 * H, linear_shape), -1.0, 1.0),
        "bs1": u(next(k), (1, linear_shape), -1.0, 1.0),
        "ws2": u(next(k), (linear_shape, f0_dim), -1.0, 1.0),
        "bs2": u(next(k), (1, f0_dim), -1.0, 1.0),
        "wm1": u(next(k), (2 * H, linear_mean), -1.0, 1.0),
        "bm1": u(next(k), (1, linear_mean), -1.0, 1.0),
        "wm2": u(next(k), (linear_mean, 1), -1.0, 1.0),
        "bm2": u(next(k), (1, 1), -1.0, 1.0),
    }
    return params


# ----------------------------------------------------------------------------
# Main
# ----------------------------------------------------------------------------

if __name__ == "__main__":
    EMB_SIZE = 32
    VOC_SIZE = 50
    HIDDEN = 32
    F0_DIM = 4
    LINEAR_SHAPE = 16
    LINEAR_MEAN = 16
    B, T = 2, 8

    root = jax.random.PRNGKey(0)
    k_params, k_sents, k_len, k_h0, k_c0 = jax.random.split(root, 5)

    params = make_params(k_params, emb_size=EMB_SIZE, voc_size=VOC_SIZE,
                         hidden=HIDDEN, f0_dim=F0_DIM,
                         linear_shape=LINEAR_SHAPE, linear_mean=LINEAR_MEAN)

    sents = jax.random.randint(k_sents, (B, T), 0, VOC_SIZE, dtype=jnp.int32)
    sent_length = jnp.full((B,), T, dtype=jnp.int32)

    # forward() draws h_0 = c_0 = torch.rand(2, B, H); done deterministically here.
    h0 = jax.random.uniform(k_h0, (2, B, HIDDEN), jnp.float32)
    c0 = jax.random.uniform(k_c0, (2, B, HIDDEN), jnp.float32)

    fwd = jax.jit(functools.partial(emb_mean_std_forward, params=params,
                                    h0=h0, c0=c0))
    out = fwd(sents, sent_length)
    jax.block_until_ready(out)

    assert out.shape == (B, T * F0_DIM), out.shape
    assert out.dtype == jnp.float32
    assert bool(jnp.isfinite(out).all())
    print("KERNEL_OK")
</pallas_src>

<mosaic_0001>
module attributes {stable_mosaic.version = 11 : i64} {
  func.func @_fused_kernel(%arg0: memref<16x2xi32, #tpu.memory_space<vmem>>, %arg1: memref<168x256xf32, #tpu.memory_space<vmem>>, %arg2: memref<112x32xf32, #tpu.memory_space<vmem>>, %arg3: memref<2x2x64xf32, #tpu.memory_space<vmem>>, %arg4: memref<2x32xf32, #tpu.memory_space<vmem>>) attributes {dimension_semantics = [], scalar_prefetch = 0 : i64, scratch_operands = 0 : i64, tpu.core_type = #tpu.core_type<tc>} {
    %c0 = arith.constant 0 : index
    %c0_0 = arith.constant 0 : index
    %0 = vector.load %arg0[%c0, %c0_0] : memref<16x2xi32, #tpu.memory_space<vmem>>, vector<16x2xi32>
    %1 = tpu.iota {dimensions = array<i32: 1>} : vector<16x104xi32>
    %2 = vector.extract_strided_slice %0 {offsets = [0, 0], sizes = [16, 1], strides = [1, 1]} : vector<16x2xi32> to vector<16x1xi32>
    %3 = vector.broadcast %2 : vector<16x1xi32> to vector<16x104xi32>
    %4 = arith.cmpi eq, %1, %3 : vector<16x104xi32>
    %5 = vector.extract_strided_slice %0 {offsets = [0, 1], sizes = [16, 1], strides = [1, 1]} : vector<16x2xi32> to vector<16x1xi32>
    %6 = vector.broadcast %5 : vector<16x1xi32> to vector<16x104xi32>
    %7 = arith.cmpi eq, %1, %6 : vector<16x104xi32>
    %8 = arith.ori %4, %7 : vector<16x104xi1>
    %c100_i32 = arith.constant 100 : i32
    %9 = vector.broadcast %c100_i32 : i32 to vector<16x104xi32>
    %10 = arith.cmpi eq, %1, %9 : vector<16x104xi32>
    %11 = arith.ori %8, %10 : vector<16x104xi1>
    %12 = arith.extui %11 : vector<16x104xi1> to vector<16x104xi32>
    %13 = arith.sitofp %12 : vector<16x104xi32> to vector<16x104xf32>
    %c0_1 = arith.constant 0 : index
    %c0_2 = arith.constant 0 : index
    %14 = vector.load %arg1[%c0_1, %c0_2] : memref<168x256xf32, #tpu.memory_space<vmem>>, vector<104x256xf32>
    %cst = arith.constant dense<0.000000e+00> : vector<16x256xf32>
    %15 = tpu.matmul %13, %14, %cst {dimension_numbers = #tpu.dot_dimension_numbers<[1], [0], [0], [1], [0, 0, 1, 1], [], []>} : vector<16x104xf32>, vector<104x256xf32>, vector<16x256xf32> -> vector<16x256xf32>
    %c104 = arith.constant 104 : index
    %c0_3 = arith.constant 0 : index
    %16 = vector.load %arg1[%c104, %c0_3] : memref<168x256xf32, #tpu.memory_space<vmem>>, vector<64x256xf32>
    %c0_4 = arith.constant 0 : index
    %c0_5 = arith.constant 0 : index
    %c0_6 = arith.constant 0 : index
    %17 = vector.load %arg3[%c0_4, %c0_5, %c0_6] : memref<2x2x64xf32, #tpu.memory_space<vmem>>, vector<1x2x64xf32>
    %18 = vector.shape_cast %17 : vector<1x2x64xf32> to vector<2x64xf32>
    %c1 = arith.constant 1 : index
    %c0_7 = arith.constant 0 : index
    %c0_8 = arith.constant 0 : index
    %19 = vector.load %arg3[%c1, %c0_7, %c0_8] : memref<2x2x64xf32, #tpu.memory_space<vmem>>, vector<1x2x64xf32>
    %20 = vector.shape_cast %19 : vector<1x2x64xf32> to vector<2x64xf32>
    %21 = vector.extract_strided_slice %15 {offsets = [0, 0], sizes = [2, 256], strides = [1, 1]} : vector<16x256xf32> to vector<2x256xf32>
    %cst_9 = arith.constant dense<0.000000e+00> : vector<2x256xf32>
    %22 = tpu.matmul %18, %16, %cst_9 {dimension_numbers = #tpu.dot_dimension_numbers<[1], [0], [0], [1], [0, 0, 1, 1], [], []>} : vector<2x64xf32>, vector<64x256xf32>, vector<2x256xf32> -> vector<2x256xf32>
    %23 = arith.addf %21, %22 : vector<2x256xf32>
    %24 = arith.negf %23 : vector<2x256xf32>
    %25 = math.exp %24 : vector<2x256xf32>
    %cst_10 = arith.constant 1.000000e+00 : f32
    %26 = vector.broadcast %cst_10 : f32 to vector<2x256xf32>
    %27 = arith.addf %26, %25 : vector<2x256xf32>
    %28 = arith.divf %26, %27 : vector<2x256xf32>
    %29 = vector.extract_strided_slice %28 {offsets = [0, 0], sizes = [2, 64], strides = [1, 1]} : vector<2x256xf32> to vector<2x64xf32>
    %30 = vector.extract_strided_slice %28 {offsets = [0, 64], sizes = [2, 64], strides = [1, 1]} : vector<2x256xf32> to vector<2x64xf32>
    %31 = vector.extract_strided_slice %23 {offsets = [0, 128], sizes = [2, 64], strides = [1, 1]} : vector<2x256xf32> to vector<2x64xf32>
    %32 = math.tanh %31 : vector<2x64xf32>
    %33 = vector.extract_strided_slice %28 {offsets = [0, 192], sizes = [2, 64], strides = [1, 1]} : vector<2x256xf32> to vector<2x64xf32>
    %34 = arith.mulf %30, %20 : vector<2x64xf32>
    %35 = arith.mulf %29, %32 : vector<2x64xf32>
    %36 = arith.addf %34, %35 : vector<2x64xf32>
    %37 = math.tanh %36 : vector<2x64xf32>
    %38 = arith.mulf %33, %37 : vector<2x64xf32>
    %39 = vector.extract_strided_slice %15 {offsets = [2, 0], sizes = [2, 256], strides = [1, 1]} : vector<16x256xf32> to vector<2x256xf32>
    %cst_11 = arith.constant dense<0.000000e+00> : vector<2x256xf32>
    %40 = tpu.matmul %38, %16, %cst_11 {dimension_numbers = #tpu.dot_dimension_numbers<[1], [0], [0], [1], [0, 0, 1, 1], [], []>} : vector<2x64xf32>, vector<64x256xf32>, vector<2x256xf32> -> vector<2x256xf32>
    %41 = arith.addf %39, %40 : vector<2x256xf32>
    %42 = arith.negf %41 : vector<2x256xf32>
    %43 = math.exp %42 : vector<2x256xf32>
    %cst_12 = arith.constant 1.000000e+00 : f32
    %44 = vector.broadcast %cst_12 : f32 to vector<2x256xf32>
    %45 = arith.addf %44, %43 : vector<2x256xf32>
    %46 = arith.divf %44, %45 : vector<2x256xf32>
    %47 = vector.extract_strided_slice %46 {offsets = [0, 0], sizes = [2, 64], strides = [1, 1]} : vector<2x256xf32> to vector<2x64xf32>
    %48 = vector.extract_strided_slice %46 {offsets = [0, 64], sizes = [2, 64], strides = [1, 1]} : vector<2x256xf32> to vector<2x64xf32>
    %49 = vector.extract_strided_slice %41 {offsets = [0, 128], sizes = [2, 64], strides = [1, 1]} : vector<2x256xf32> to vector<2x64xf32>
    %50 = math.tanh %49 : vector<2x64xf32>
    %51 = vector.extract_strided_slice %46 {offsets = [0, 192], sizes = [2, 64], strides = [1, 1]} : vector<2x256xf32> to vector<2x64xf32>
    %52 = arith.mulf %48, %36 : vector<2x64xf32>
    %53 = arith.mulf %47, %50 : vector<2x64xf32>
    %54 = arith.addf %52, %53 : vector<2x64xf32>
    %55 = math.tanh %54 : vector<2x64xf32>
    %56 = arith.mulf %51, %55 : vector<2x64xf32>
    %57 = vector.extract_strided_slice %15 {offsets = [4, 0], sizes = [2, 256], strides = [1, 1]} : vector<16x256xf32> to vector<2x256xf32>
    %cst_13 = arith.constant dense<0.000000e+00> : vector<2x256xf32>
    %58 = tpu.matmul %56, %16, %cst_13 {dimension_numbers = #tpu.dot_dimension_numbers<[1], [0], [0], [1], [0, 0, 1, 1], [], []>} : vector<2x64xf32>, vector<64x256xf32>, vector<2x256xf32> -> vector<2x256xf32>
    %59 = arith.addf %57, %58 : vector<2x256xf32>
    %60 = arith.negf %59 : vector<2x256xf32>
    %61 = math.exp %60 : vector<2x256xf32>
    %cst_14 = arith.constant 1.000000e+00 : f32
    %62 = vector.broadcast %cst_14 : f32 to vector<2x256xf32>
    %63 = arith.addf %62, %61 : vector<2x256xf32>
    %64 = arith.divf %62, %63 : vector<2x256xf32>
    %65 = vector.extract_strided_slice %64 {offsets = [0, 0], sizes = [2, 64], strides = [1, 1]} : vector<2x256xf32> to vector<2x64xf32>
    %66 = vector.extract_strided_slice %64 {offsets = [0, 64], sizes = [2, 64], strides = [1, 1]} : vector<2x256xf32> to vector<2x64xf32>
    %67 = vector.extract_strided_slice %59 {offsets = [0, 128], sizes = [2, 64], strides = [1, 1]} : vector<2x256xf32> to vector<2x64xf32>
    %68 = math.tanh %67 : vector<2x64xf32>
    %69 = vector.extract_strided_slice %64 {offsets = [0, 192], sizes = [2, 64], strides = [1, 1]} : vector<2x256xf32> to vector<2x64xf32>
    %70 = arith.mulf %66, %54 : vector<2x64xf32>
    %71 = arith.mulf %65, %68 : vector<2x64xf32>
    %72 = arith.addf %70, %71 : vector<2x64xf32>
    %73 = math.tanh %72 : vector<2x64xf32>
    %74 = arith.mulf %69, %73 : vector<2x64xf32>
    %75 = vector.extract_strided_slice %15 {offsets = [6, 0], sizes = [2, 256], strides = [1, 1]} : vector<16x256xf32> to vector<2x256xf32>
    %cst_15 = arith.constant dense<0.000000e+00> : vector<2x256xf32>
    %76 = tpu.matmul %74, %16, %cst_15 {dimension_numbers = #tpu.dot_dimension_numbers<[1], [0], [0], [1], [0, 0, 1, 1], [], []>} : vector<2x64xf32>, vector<64x256xf32>, vector<2x256xf32> -> vector<2x256xf32>
    %77 = arith.addf %75, %76 : vector<2x256xf32>
    %78 = arith.negf %77 : vector<2x256xf32>
    %79 = math.exp %78 : vector<2x256xf32>
    %cst_16 = arith.constant 1.000000e+00 : f32
    %80 = vector.broadcast %cst_16 : f32 to vector<2x256xf32>
    %81 = arith.addf %80, %79 : vector<2x256xf32>
    %82 = arith.divf %80, %81 : vector<2x256xf32>
    %83 = vector.extract_strided_slice %82 {offsets = [0, 0], sizes = [2, 64], strides = [1, 1]} : vector<2x256xf32> to vector<2x64xf32>
    %84 = vector.extract_strided_slice %82 {offsets = [0, 64], sizes = [2, 64], strides = [1, 1]} : vector<2x256xf32> to vector<2x64xf32>
    %85 = vector.extract_strided_slice %77 {offsets = [0, 128], sizes = [2, 64], strides = [1, 1]} : vector<2x256xf32> to vector<2x64xf32>
    %86 = math.tanh %85 : vector<2x64xf32>
    %87 = vector.extract_strided_slice %82 {offsets = [0, 192], sizes = [2, 64], strides = [1, 1]} : vector<2x256xf32> to vector<2x64xf32>
    %88 = arith.mulf %84, %72 : vector<2x64xf32>
    %89 = arith.mulf %83, %86 : vector<2x64xf32>
    %90 = arith.addf %88, %89 : vector<2x64xf32>
    %91 = math.tanh %90 : vector<2x64xf32>
    %92 = arith.mulf %87, %91 : vector<2x64xf32>
    %93 = vector.extract_strided_slice %15 {offsets = [8, 0], sizes = [2, 256], strides = [1, 1]} : vector<16x256xf32> to vector<2x256xf32>
    %cst_17 = arith.constant dense<0.000000e+00> : vector<2x256xf32>
    %94 = tpu.matmul %92, %16, %cst_17 {dimension_numbers = #tpu.dot_dimension_numbers<[1], [0], [0], [1], [0, 0, 1, 1], [], []>} : vector<2x64xf32>, vector<64x256xf32>, vector<2x256xf32> -> vector<2x256xf32>
    %95 = arith.addf %93, %94 : vector<2x256xf32>
    %96 = arith.negf %95 : vector<2x256xf32>
    %97 = math.exp %96 : vector<2x256xf32>
    %cst_18 = arith.constant 1.000000e+00 : f32
    %98 = vector.broadcast %cst_18 : f32 to vector<2x256xf32>
    %99 = arith.addf %98, %97 : vector<2x256xf32>
    %100 = arith.divf %98, %99 : vector<2x256xf32>
    %101 = vector.extract_strided_slice %100 {offsets = [0, 0], sizes = [2, 64], strides = [1, 1]} : vector<2x256xf32> to vector<2x64xf32>
    %102 = vector.extract_strided_slice %100 {offsets = [0, 64], sizes = [2, 64], strides = [1, 1]} : vector<2x256xf32> to vector<2x64xf32>
    %103 = vector.extract_strided_slice %95 {offsets = [0, 128], sizes = [2, 64], strides = [1, 1]} : vector<2x256xf32> to vector<2x64xf32>
    %104 = math.tanh %103 : vector<2x64xf32>
    %105 = vector.extract_strided_slice %100 {offsets = [0, 192], sizes = [2, 64], strides = [1, 1]} : vector<2x256xf32> to vector<2x64xf32>
    %106 = arith.mulf %102, %90 : vector<2x64xf32>
    %107 = arith.mulf %101, %104 : vector<2x64xf32>
    %108 = arith.addf %106, %107 : vector<2x64xf32>
    %109 = math.tanh %108 : vector<2x64xf32>
    %110 = arith.mulf %105, %109 : vector<2x64xf32>
    %111 = vector.extract_strided_slice %15 {offsets = [10, 0], sizes = [2, 256], strides = [1, 1]} : vector<16x256xf32> to vector<2x256xf32>
    %cst_19 = arith.constant dense<0.000000e+00> : vector<2x256xf32>
    %112 = tpu.matmul %110, %16, %cst_19 {dimension_numbers = #tpu.dot_dimension_numbers<[1], [0], [0], [1], [0, 0, 1, 1], [], []>} : vector<2x64xf32>, vector<64x256xf32>, vector<2x256xf32> -> vector<2x256xf32>
    %113 = arith.addf %111, %112 : vector<2x256xf32>
    %114 = arith.negf %113 : vector<2x256xf32>
    %115 = math.exp %114 : vector<2x256xf32>
    %cst_20 = arith.constant 1.000000e+00 : f32
    %116 = vector.broadcast %cst_20 : f32 to vector<2x256xf32>
    %117 = arith.addf %116, %115 : vector<2x256xf32>
    %118 = arith.divf %116, %117 : vector<2x256xf32>
    %119 = vector.extract_strided_slice %118 {offsets = [0, 0], sizes = [2, 64], strides = [1, 1]} : vector<2x256xf32> to vector<2x64xf32>
    %120 = vector.extract_strided_slice %118 {offsets = [0, 64], sizes = [2, 64], strides = [1, 1]} : vector<2x256xf32> to vector<2x64xf32>
    %121 = vector.extract_strided_slice %113 {offsets = [0, 128], sizes = [2, 64], strides = [1, 1]} : vector<2x256xf32> to vector<2x64xf32>
    %122 = math.tanh %121 : vector<2x64xf32>
    %123 = vector.extract_strided_slice %118 {offsets = [0, 192], sizes = [2, 64], strides = [1, 1]} : vector<2x256xf32> to vector<2x64xf32>
    %124 = arith.mulf %120, %108 : vector<2x64xf32>
    %125 = arith.mulf %119, %122 : vector<2x64xf32>
    %126 = arith.addf %124, %125 : vector<2x64xf32>
    %127 = math.tanh %126 : vector<2x64xf32>
    %128 = arith.mulf %123, %127 : vector<2x64xf32>
    %129 = vector.extract_strided_slice %15 {offsets = [12, 0], sizes = [2, 256], strides = [1, 1]} : vector<16x256xf32> to vector<2x256xf32>
    %cst_21 = arith.constant dense<0.000000e+00> : vector<2x256xf32>
    %130 = tpu.matmul %128, %16, %cst_21 {dimension_numbers = #tpu.dot_dimension_numbers<[1], [0], [0], [1], [0, 0, 1, 1], [], []>} : vector<2x64xf32>, vector<64x256xf32>, vector<2x256xf32> -> vector<2x256xf32>
    %131 = arith.addf %129, %130 : vector<2x256xf32>
    %132 = arith.negf %131 : vector<2x256xf32>
    %133 = math.exp %132 : vector<2x256xf32>
    %cst_22 = arith.constant 1.000000e+00 : f32
    %134 = vector.broadcast %cst_22 : f32 to vector<2x256xf32>
    %135 = arith.addf %134, %133 : vector<2x256xf32>
    %136 = arith.divf %134, %135 : vector<2x256xf32>
    %137 = vector.extract_strided_slice %136 {offsets = [0, 0], sizes = [2, 64], strides = [1, 1]} : vector<2x256xf32> to vector<2x64xf32>
    %138 = vector.extract_strided_slice %136 {offsets = [0, 64], sizes = [2, 64], strides = [1, 1]} : vector<2x256xf32> to vector<2x64xf32>
    %139 = vector.extract_strided_slice %131 {offsets = [0, 128], sizes = [2, 64], strides = [1, 1]} : vector<2x256xf32> to vector<2x64xf32>
    %140 = math.tanh %139 : vector<2x64xf32>
    %141 = vector.extract_strided_slice %136 {offsets = [0, 192], sizes = [2, 64], strides = [1, 1]} : vector<2x256xf32> to vector<2x64xf32>
    %142 = arith.mulf %138, %126 : vector<2x64xf32>
    %143 = arith.mulf %137, %140 : vector<2x64xf32>
    %144 = arith.addf %142, %143 : vector<2x64xf32>
    %145 = math.tanh %144 : vector<2x64xf32>
    %146 = arith.mulf %141, %145 : vector<2x64xf32>
    %147 = vector.extract_strided_slice %15 {offsets = [14, 0], sizes = [2, 256], strides = [1, 1]} : vector<16x256xf32> to vector<2x256xf32>
    %cst_23 = arith.constant dense<0.000000e+00> : vector<2x256xf32>
    %148 = tpu.matmul %146, %16, %cst_23 {dimension_numbers = #tpu.dot_dimension_numbers<[1], [0], [0], [1], [0, 0, 1, 1], [], []>} : vector<2x64xf32>, vector<64x256xf32>, vector<2x256xf32> -> vector<2x256xf32>
    %149 = arith.addf %147, %148 : vector<2x256xf32>
    %150 = arith.negf %149 : vector<2x256xf32>
    %151 = math.exp %150 : vector<2x256xf32>
    %cst_24 = arith.constant 1.000000e+00 : f32
    %152 = vector.broadcast %cst_24 : f32 to vector<2x256xf32>
    %153 = arith.addf %152, %151 : vector<2x256xf32>
    %154 = arith.divf %152, %153 : vector<2x256xf32>
    %155 = vector.extract_strided_slice %154 {offsets = [0, 0], sizes = [2, 64], strides = [1, 1]} : vector<2x256xf32> to vector<2x64xf32>
    %156 = vector.extract_strided_slice %154 {offsets = [0, 64], sizes = [2, 64], strides = [1, 1]} : vector<2x256xf32> to vector<2x64xf32>
    %157 = vector.extract_strided_slice %149 {offsets = [0, 128], sizes = [2, 64], strides = [1, 1]} : vector<2x256xf32> to vector<2x64xf32>
    %158 = math.tanh %157 : vector<2x64xf32>
    %159 = vector.extract_strided_slice %154 {offsets = [0, 192], sizes = [2, 64], strides = [1, 1]} : vector<2x256xf32> to vector<2x64xf32>
    %160 = arith.mulf %156, %144 : vector<2x64xf32>
    %161 = arith.mulf %155, %158 : vector<2x64xf32>
    %162 = arith.addf %160, %161 : vector<2x64xf32>
    %163 = math.tanh %162 : vector<2x64xf32>
    %164 = arith.mulf %159, %163 : vector<2x64xf32>
    %165 = vector.extract_strided_slice %38 {offsets = [0, 0], sizes = [2, 32], strides = [1, 1]} : vector<2x64xf32> to vector<2x32xf32>
    %166 = vector.extract_strided_slice %164 {offsets = [0, 32], sizes = [2, 32], strides = [1, 1]} : vector<2x64xf32> to vector<2x32xf32>
    %167 = tpu.concatenate %165, %166 in 1 : vector<2x32xf32>, vector<2x32xf32> -> vector<2x64xf32>
    %168 = vector.extract_strided_slice %56 {offsets = [0, 0], sizes = [2, 32], strides = [1, 1]} : vector<2x64xf32> to vector<2x32xf32>
    %169 = vector.extract_strided_slice %146 {offsets = [0, 32], sizes = [2, 32], strides = [1, 1]} : vector<2x64xf32> to vector<2x32xf32>
    %170 = tpu.concatenate %168, %169 in 1 : vector<2x32xf32>, vector<2x32xf32> -> vector<2x64xf32>
    %171 = vector.extract_strided_slice %74 {offsets = [0, 0], sizes = [2, 32], strides = [1, 1]} : vector<2x64xf32> to vector<2x32xf32>
    %172 = vector.extract_strided_slice %128 {offsets = [0, 32], sizes = [2, 32], strides = [1, 1]} : vector<2x64xf32> to vector<2x32xf32>
    %173 = tpu.concatenate %171, %172 in 1 : vector<2x32xf32>, vector<2x32xf32> -> vector<2x64xf32>
    %174 = vector.extract_strided_slice %92 {offsets = [0, 0], sizes = [2, 32], strides = [1, 1]} : vector<2x64xf32> to vector<2x32xf32>
    %175 = vector.extract_strided_slice %110 {offsets = [0, 32], sizes = [2, 32], strides = [1, 1]} : vector<2x64xf32> to vector<2x32xf32>
    %176 = tpu.concatenate %174, %175 in 1 : vector<2x32xf32>, vector<2x32xf32> -> vector<2x64xf32>
    %177 = vector.extract_strided_slice %110 {offsets = [0, 0], sizes = [2, 32], strides = [1, 1]} : vector<2x64xf32> to vector<2x32xf32>
    %178 = vector.extract_strided_slice %92 {offsets = [0, 32], sizes = [2, 32], strides = [1, 1]} : vector<2x64xf32> to vector<2x32xf32>
    %179 = tpu.concatenate %177, %178 in 1 : vector<2x32xf32>, vector<2x32xf32> -> vector<2x64xf32>
    %180 = vector.extract_strided_slice %128 {offsets = [0, 0], sizes = [2, 32], strides = [1, 1]} : vector<2x64xf32> to vector<2x32xf32>
    %181 = vector.extract_strided_slice %74 {offsets = [0, 32], sizes = [2, 32], strides = [1, 1]} : vector<2x64xf32> to vector<2x32xf32>
    %182 = tpu.concatenate %180, %181 in 1 : vector<2x32xf32>, vector<2x32xf32> -> vector<2x64xf32>
    %183 = vector.extract_strided_slice %146 {offsets = [0, 0], sizes = [2, 32], strides = [1, 1]} : vector<2x64xf32> to vector<2x32xf32>
    %184 = vector.extract_strided_slice %56 {offsets = [0, 32], sizes = [2, 32], strides = [1, 1]} : vector<2x64xf32> to vector<2x32xf32>
    %185 = tpu.concatenate %183, %184 in 1 : vector<2x32xf32>, vector<2x32xf32> -> vector<2x64xf32>
    %186 = vector.extract_strided_slice %164 {offsets = [0, 0], sizes = [2, 32], strides = [1, 1]} : vector<2x64xf32> to vector<2x32xf32>
    %187 = vector.extract_strided_slice %38 {offsets = [0, 32], sizes = [2, 32], strides = [1, 1]} : vector<2x64xf32> to vector<2x32xf32>
    %188 = tpu.concatenate %186, %187 in 1 : vector<2x32xf32>, vector<2x32xf32> -> vector<2x64xf32>
    %189 = tpu.concatenate %167, %170, %173, %176, %179, %182, %185, %188 in 0 : vector<2x64xf32>, vector<2x64xf32>, vector<2x64xf32>, vector<2x64xf32>, vector<2x64xf32>, vector<2x64xf32>, vector<2x64xf32>, vector<2x64xf32> -> vector<16x64xf32>
    %c0_25 = arith.constant 0 : index
    %c0_26 = arith.constant 0 : index
    %190 = vector.load %arg2[%c0_25, %c0_26] : memref<112x32xf32, #tpu.memory_space<vmem>>, vector<64x32xf32>
    %c64 = arith.constant 64 : index
    %c0_27 = arith.constant 0 : index
    %191 = vector.load %arg2[%c64, %c0_27] : memref<112x32xf32, #tpu.memory_space<vmem>>, vector<1x32xf32>
    %c72 = arith.constant 72 : index
    %c0_28 = arith.constant 0 : index
    %192 = vector.load %arg2[%c72, %c0_28] : memref<112x32xf32, #tpu.memory_space<vmem>>, vector<32x32xf32>
    %c104_29 = arith.constant 104 : index
    %c0_30 = arith.constant 0 : index
    %193 = vector.load %arg2[%c104_29, %c0_30] : memref<112x32xf32, #tpu.memory_space<vmem>>, vector<1x32xf32>
    %cst_31 = arith.constant dense<0.000000e+00> : vector<16x32xf32>
    %194 = tpu.matmul %189, %190, %cst_31 {dimension_numbers = #tpu.dot_dimension_numbers<[1], [0], [0], [1], [0, 0, 1, 1], [], []>} : vector<16x64xf32>, vector<64x32xf32>, vector<16x32xf32> -> vector<16x32xf32>
    %195 = vector.broadcast %191 : vector<1x32xf32> to vector<16x32xf32>
    %196 = arith.addf %194, %195 : vector<16x32xf32>
    %cst_32 = arith.constant 0.000000e+00 : f32
    %197 = vector.broadcast %cst_32 : f32 to vector<16x32xf32>
    %198 = arith.maximumf %196, %197 : vector<16x32xf32>
    %cst_33 = arith.constant dense<0.000000e+00> : vector<16x32xf32>
    %199 = tpu.matmul %198, %192, %cst_33 {dimension_numbers = #tpu.dot_dimension_numbers<[1], [0], [0], [1], [0, 0, 1, 1], [], []>} : vector<16x32xf32>, vector<32x32xf32>, vector<16x32xf32> -> vector<16x32xf32>
    %200 = vector.broadcast %193 : vector<1x32xf32> to vector<16x32xf32>
    %201 = arith.addf %199, %200 : vector<16x32xf32>
    %202 = vector.extract_strided_slice %201 {offsets = [0, 0], sizes = [2, 4], strides = [1, 1]} : vector<16x32xf32> to vector<2x4xf32>
    %203 = vector.extract_strided_slice %201 {offsets = [2, 0], sizes = [2, 4], strides = [1, 1]} : vector<16x32xf32> to vector<2x4xf32>
    %204 = vector.extract_strided_slice %201 {offsets = [4, 0], sizes = [2, 4], strides = [1, 1]} : vector<16x32xf32> to vector<2x4xf32>
    %205 = vector.extract_strided_slice %201 {offsets = [6, 0], sizes = [2, 4], strides = [1, 1]} : vector<16x32xf32> to vector<2x4xf32>
    %206 = vector.extract_strided_slice %201 {offsets = [8, 0], sizes = [2, 4], strides = [1, 1]} : vector<16x32xf32> to vector<2x4xf32>
    %207 = vector.extract_strided_slice %201 {offsets = [10, 0], sizes = [2, 4], strides = [1, 1]} : vector<16x32xf32> to vector<2x4xf32>
    %208 = vector.extract_strided_slice %201 {offsets = [12, 0], sizes = [2, 4], strides = [1, 1]} : vector<16x32xf32> to vector<2x4xf32>
    %209 = vector.extract_strided_slice %201 {offsets = [14, 0], sizes = [2, 4], strides = [1, 1]} : vector<16x32xf32> to vector<2x4xf32>
    %210 = tpu.concatenate %202, %203, %204, %205, %206, %207, %208, %209 in 1 : vector<2x4xf32>, vector<2x4xf32>, vector<2x4xf32>, vector<2x4xf32>, vector<2x4xf32>, vector<2x4xf32>, vector<2x4xf32>, vector<2x4xf32> -> vector<2x32xf32>
    %c0_34 = arith.constant 0 : index
    %c0_35 = arith.constant 0 : index
    %211 = vector.load %arg4[%c0_34, %c0_35] : memref<2x32xf32, #tpu.memory_space<vmem>>, vector<2x32xf32>
    tpu.vector_store %arg4[%c0_34, %c0_35], %210 {strides = array<i32>} : memref<2x32xf32, #tpu.memory_space<vmem>>, vector<2x32xf32>,
    return
  }
}

</mosaic_0001>

<bundles_post_ra>
// kernel: emb_mean_std_forward.1
= control target key start
LH: loop header
LB: loop body
LE: loop exit
PB: predicated region body
PF: predicated region fallthrough
CT: control target
= control target key end

     0   :  { %9 = vsyncpa [#allocation3], 0  ;;  %s2009_s0 = inlined_call_operand.vmem [shape: s32[16,2], index: 0, kind: input, shape index: {}]   ;;  %s2010_s1 = inlined_call_operand.hbm [shape: f32[168,256], index: 1, kind: input, shape index: {}]   ;;  %s2011_s2 = inlined_call_operand.hbm [shape: f32[112,32], index: 2, kind: input, shape index: {}]   ;;  %s2012_s3 = inlined_call_operand.vmem [shape: f32[2,2,64], index: 3, kind: input, shape index: {}]   ;;  %s2013_s4 = inlined_call_operand.hbm [shape: f32[2,32], index: 4, kind: output, shape index: {}]  }
   0x1   :  { %10 = vsyncpa [#allocation6], 0 }
   0x2   :  { %11 = vsyncpa [#allocation4], 0  ;;  %s1646_s15 = smov [#allocation2]  }
   0x3   :  { %s19_s16 = sshll.u32 %s1646_s15, 4  ;;  %s20_s16 = int_to_ptr.vmem [resolvable:$true] %s19_s16 }
   0x4   :  { %s1588_s17 = scalar_lea.vmem %s20_s16, 5376  ;;  %p1593_p1 = scmp.lt.s32.totalorder %s20_s16, %s20_s16 }
   0x5   :  { %p1589_p0 = scmp.ne.s32.totalorder %s20_s16, %s1588_s17  ;;  %p1594_p2 = scmp.lt.s32.totalorder %s1588_s17, %s1588_s17 }
   0x7   :  { %p1595_p3 = por %p1594_p2, %p1593_p1 }
   0x9   :  { %p1596_p4 = pnand %p1595_p3, %p1589_p0 }
   0xb   :  { %1599 = shalt.err (!%p1596_p4)
}
   0xc   :  { %s1647_s18 = smov 256   ;;  %s1648_s19 = smov 16  }
   0xd   :  { %25 = dma.hbm_to_vmem [thread:$0]  %s2010_s1, 5376, %s20_s16, [#allocation3], %s1647_s18, %s1647_s18, %s1648_s19  }
   0xe   :  { %s1649_s22 = smov [#allocation5]  }
   0xf   :  { %s31_s23 = sshll.u32 %s1649_s22, 4  ;;  %s32_s23 = int_to_ptr.vmem [resolvable:$true] %s31_s23 }
  0x10   :  { %s1608_s24 = scalar_lea.vmem %s32_s23, 1792  ;;  %p1613_p6 = scmp.lt.s32.totalorder %s32_s23, %s32_s23 }
  0x11   :  { %p1609_p5 = scmp.ne.s32.totalorder %s32_s23, %s1608_s24  ;;  %p1614_p7 = scmp.lt.s32.totalorder %s1608_s24, %s1608_s24 }
  0x13   :  { %p1615_p8 = por %p1614_p7, %p1613_p6 }
  0x15   :  { %p1616_p9 = pnand %p1615_p8, %p1609_p5 }
  0x17   :  { %1619 = shalt.err (!%p1616_p9)
}
  0x18   :  { %s1650_s25 = smov 128   ;;  %s1651_s26 = smov 8  }
  0x19   :  { %37 = dma.hbm_to_vmem [thread:$0]  %s2011_s2, 1792, %s32_s23, [#allocation6], %s1650_s25, %s1650_s25, %s1651_s26  }
  0x1a   :  { %1640 = dma.done.wait [#allocation3], 5376  }
  0x1b   :  { %1641 = vsyncadd [#allocation3], 4294961920 }
  0x1c   :  { %1642 = dma.done.wait [#allocation6], 1792  }
  0x1d   :  { %1643 = vsyncadd [#allocation6], 4294965504  ;;  %v1652_v0 = vmov 0   ;;  %v46_v1 = vld [vmem:[%s2009_s0] sm:$0xff]  ;;  %v100_v2 = vld [vmem:[#allocation2 + $0xc8] sm:$0xff]  ;;  %v1653_v9 = vmov 0.0   ;;  %v48_v48 = vlaneseq }
  0x1e   :  { %1481 = vset.pattern.permute.xlu0 %v1652_v0  ;;  %1483 = vset.pattern.permute.xlu1 %v1652_v0  ;;  %v99_v3 = vld [vmem:[#allocation2 + $0xc0] sm:$0xff]  ;;  %v98_v4 = vld [vmem:[#allocation2 + $0xb8] sm:$0xff]  ;;  %v97_v5 = vld [vmem:[#allocation2 + $0xb0] sm:$0xff]  ;;  %v1654_v12 = vmov 1   ;;  %vm204_vm0 = vcmask 523264   ;;  %s1655_s7 = smov 64  }
  0x1f   :  { %51 = vperm.xlu0 %1481, %v46_v1   ;;  %114 = vmatprep.subr.mxu0 %v100_v2  ;;  %v96_v6 = vld [vmem:[#allocation2 + $0xa8] sm:$0xff]  ;;  %v95_v7 = vld [vmem:[#allocation2 + $0xa0] sm:$0xff]  ;;  %v94_v10 = vld [vmem:[#allocation2 + $0x98] sm:$0xff]  ;;  %v1775_v50 = vand.u32 127, %v48_v48  ;;  %vm101_vm5 = vcmask 850944   ;;  %vm1075_vm11 = vcmask 261120  }
  0x20   :  { %115 = vmatpush1.msra.mxu0 %v99_v3  ;;  %v1698_v8 = vld [vmem:[#allocation2 + $0x148] sm:$0xff]  ;;  %272 = vmatprep.mubr.f32.mxu1 %v1653_v9  ;;  %v1702_v11 = vld [vmem:[#allocation2 + $0x140] sm:$0xff]  ;;  %v93_v13 = vld [vmem:[#allocation2 + $0x90] sm:$0xff]  ;;  %vm1128_vm12 = vcmask 1041408   ;;  %vm1132_vm13 = vcmask 1045504   ;;  %vm1130_vm14 = vcmask 1043456  }
  0x21   :  { %116 = vmatprep.subr.mxu0 %v98_v4  ;;  %224 = vmatprep.subr.mxu1 %v1698_v8  ;;  %v1704_v14 = vld [vmem:[#allocation2 + $0x138] sm:$0xff]  ;;  %v92_v15 = vld [vmem:[#allocation2 + $0x88] sm:$0xff]  ;;  %v1706_v16 = vld [vmem:[#allocation2 + $0x130] sm:$0xff]  ;;  %vm68_vm1 = vcmp.eq.s32.totalorder %v1775_v50, 100  ;;  %s1657_s9 = smov 4   ;;  %s1658_s10 = smov 24  }
  0x22   :  { %117 = vmatpush1.msra.mxu0 %v97_v5  ;;  %v91_v17 = vld [vmem:[#allocation2 + $0x80] sm:$0xff]  ;;  %225 = vmatpush1.msra.mxu1 %v1702_v11  ;;  %v1709_v18 = vld [vmem:[#allocation2 + $0x128] sm:$0xff]  ;;  %v90_v19 = vld [vmem:[#allocation2 + $0x78] sm:$0xff]  ;;  %s1659_s11 = smov 12   ;;  %s1660_s12 = smov 28   ;;  %vm1352_vm15 = vcmask 31744  }
  0x23   :  { %1482 = vset.pattern.permute.xlu0 %v1654_v12  ;;  %118 = vmatprep.subr.mxu0 %v96_v6  ;;  %v1712_v20 = vld [vmem:[#allocation2 + $0x120] sm:$0xff]  ;;  %v89_v21 = vld [vmem:[#allocation2 + $0x70] sm:$0xff]  ;;  %v1715_v22 = vld [vmem:[#allocation2 + $0x118] sm:$0xff]  ;;  %s1661_s13 = smov [#allocation7]  }
  0x24   :  { %59 = vperm.xlu0 %1482, %v46_v1   ;;  %119 = vmatpush1.msra.mxu0 %v95_v7  ;;  %v88_v23 = vld [vmem:[#allocation2 + $0x68] sm:$0xff]  ;;  %v1718_v24 = vld [vmem:[#allocation2 + $0x110] sm:$0xff]  ;;  %v87_v25 = vld [vmem:[#allocation2 + $0x60] sm:$0xff]  ;;  %s1374_s14 = sshll.u32 %s1661_s13, 4  ;;  %s1375_s14 = int_to_ptr.vmem [resolvable:$true] %s1374_s14 }
  0x25   :  { %120 = vmatprep.subr.mxu0 %v94_v10  ;;  %226 = vmatprep.subr.mxu1 %v1704_v14  ;;  %v1721_v26 = vld [vmem:[#allocation2 + $0x108] sm:$0xff]  ;;  %v86_v27 = vld [vmem:[#allocation2 + $0x58] sm:$0xff]  ;;  %v1724_v28 = vld [vmem:[#allocation2 + $0x100] sm:$0xff]  ;;  %s1620_s15 = scalar_lea.vmem %s1375_s14, 32  ;;  %p1625_p11 = scmp.lt.s32.totalorder %s1375_s14, %s1375_s14 }
  0x26   :  { %121 = vmatpush1.msra.mxu0 %v93_v13  ;;  %227 = vmatpush1.msra.mxu1 %v1706_v16  ;;  %v85_v29 = vld [vmem:[#allocation2 + $0x50] sm:$0xff]  ;;  %v1727_v30 = vld [vmem:[#allocation2 + $0xf8] sm:$0xff]  ;;  %v84_v31 = vld [vmem:[#allocation2 + $0x48] sm:$0xff]  ;;  %p1621_p10 = scmp.ne.s32.totalorder %s1375_s14, %s1620_s15  ;;  %p1626_p12 = scmp.lt.s32.totalorder %s1620_s15, %s1620_s15 }
  0x27   :  { %122 = vmatprep.subr.mxu0 %v92_v15  ;;  %228 = vmatprep.subr.mxu1 %v1709_v18  ;;  %v1730_v32 = vld [vmem:[#allocation2 + $0xf0] sm:$0xff]  ;;  %v83_v33 = vld [vmem:[#allocation2 + $0x40] sm:$0xff]  ;;  %v1733_v34 = vld [vmem:[#allocation2 + $0xe8] sm:$0xff] }
  0x28   :  { %123 = vmatpush1.msra.mxu0 %v91_v17  ;;  %229 = vmatpush1.msra.mxu1 %v1712_v20  ;;  %v82_v35 = vld [vmem:[#allocation2 + $0x38] sm:$0xff]  ;;  %v1736_v36 = vld [vmem:[#allocation2 + $0xe0] sm:$0xff]  ;;  %v81_v37 = vld [vmem:[#allocation2 + $0x30] sm:$0xff]  ;;  %p1627_p13 = por %p1626_p12, %p1625_p11 }
  0x29   :  { %124 = vmatprep.subr.mxu0 %v90_v19  ;;  %230 = vmatprep.subr.mxu1 %v1715_v22  ;;  %v1739_v38 = vld [vmem:[#allocation2 + $0xd8] sm:$0xff]  ;;  %v80_v39 = vld [vmem:[#allocation2 + $0x28] sm:$0xff]  ;;  %v1742_v40 = vld [vmem:[#allocation2 + $0xd0] sm:$0xff] }
  0x2a   :  { %125 = vmatpush1.msra.mxu0 %v89_v21  ;;  %231 = vmatpush1.msra.mxu1 %v1718_v24  ;;  %v79_v41 = vld [vmem:[#allocation2 + $0x20] sm:$0xff]  ;;  %v78_v43 = vld [vmem:[#allocation2 + $0x18] sm:$0xff]  ;;  %v77_v44 = vld [vmem:[#allocation2 + $0x10] sm:$0xff]  ;;  %p1628_p0 = pnand %p1627_p13, %p1621_p10 }
  0x2b   :  { %126 = vmatprep.subr.mxu0 %v88_v23  ;;  %232 = vmatprep.subr.mxu1 %v1721_v26  ;;  %v201_v42 = vld [vmem:[%s2012_s3] sm:$0x3]  ;;  %v1388_v45 = vld [vmem:[%s2012_s3 + $0x2] sm:$0x3]  ;;  %v76_v46 = vld [vmem:[#allocation2 + $0x8] sm:$0xff] }
  0x2c   :  { %127 = vmatpush1.msra.mxu0 %v87_v25  ;;  %233 = vmatpush1.msra.mxu1 %v1724_v28  ;;  %v75_v47 = vld [vmem:[#allocation2] sm:$0xff]  ;;  %v47_v17 = vld [vmem:[%s2009_s0 + $0x8] sm:$0xff]  ;;  %s1656_s0 = smov 20  }
  0x2d   :  { %128 = vmatprep.subr.mxu0 %v86_v27  ;;  %234 = vmatprep.subr.mxu1 %v1727_v30 }
  0x2e   :  { %129 = vmatpush1.msra.mxu0 %v85_v29  ;;  %235 = vmatpush1.msra.mxu1 %v1730_v32 }
  0x2f   :  { %130 = vmatprep.subr.mxu0 %v84_v31  ;;  %236 = vmatprep.subr.mxu1 %v1733_v34 }
  0x30   :  { %131 = vmatpush1.msra.mxu0 %v83_v33  ;;  %237 = vmatpush1.msra.mxu1 %v1736_v36 }
  0x31   :  { %132 = vmatprep.subr.mxu0 %v82_v35  ;;  %238 = vmatprep.subr.mxu1 %v1739_v38 }
  0x32   :  { %133 = vmatpush1.msra.mxu0 %v81_v37  ;;  %239 = vmatpush1.msra.mxu1 %v1742_v40 }
  0x33   :  { %134 = vmatprep.subr.mxu0 %v80_v39  ;;  %1389 = vmatmul.mubr.msk.f32.vlgmr.msra.gmra.mxu1 %vm204_vm0, %v201_v42 }
  0x34   :  { %135 = vmatpush1.msra.mxu0 %v79_v41  ;;  %172 = vmatprep.mubr.f32.mxu0 %v1653_v9 }
  0x35   :  { %136 = vmatprep.subr.mxu0 %v78_v43  ;;  %295 = vrot.lane.b32.xlu1 %v1388_v45, %s1655_s7 }
  0x36   :  { %137 = vmatpush1.msra.mxu0 %v77_v44  ;;  %328 = vmatprep.subr.mxu1 %v1698_v8 }
  0x37   :  { %138 = vmatprep.subr.mxu0 %v76_v46  ;;  %329 = vmatpush1.msra.mxu1 %v1702_v11 }
  0x38   :  { %139 = vmatpush1.msra.mxu0 %v75_v47  ;;  %330 = vmatprep.subr.mxu1 %v1704_v14 }
  0x39   :  { %376 = vmatprep.mubr.f32.mxu1 %v1653_v9  ;;  %331 = vmatpush1.msra.mxu1 %v1706_v16 }
  0x3a   :  { %438 = vmatprep.subr.mxu0 %v1698_v8  ;;  %332 = vmatprep.subr.mxu1 %v1709_v18 }
  0x3b   :  { %333 = vmatpush1.msra.mxu1 %v1712_v20 }
  0x3c   :  { %334 = vmatprep.subr.mxu1 %v1715_v22 }
  0x3d   :  { %335 = vmatpush1.msra.mxu1 %v1718_v24 }
  0x3e   :  { %336 = vmatprep.subr.mxu1 %v1721_v26 }
  0x3f   :  { %337 = vmatpush1.msra.mxu1 %v1724_v28 }
  0x40   :  { %338 = vmatprep.subr.mxu1 %v1727_v30 }
  0x41   :  { %339 = vmatpush1.msra.mxu1 %v1730_v32 }
  0x42   :  { %340 = vmatprep.subr.mxu1 %v1733_v34 }
  0x43   :  { %341 = vmatpush1.msra.mxu1 %v1736_v36 }
  0x44   :  { %342 = vmatprep.subr.mxu1 %v1739_v38 }
  0x45   :  { %343 = vmatpush1.msra.mxu1 %v1742_v40 }
  0x46   :  { %548 = vmatprep.subr.mxu1 %v1698_v8 }
  0x9a   :  { %v52_v49 = vpop.permute.xlu0 %51 }
  0x9b   :  { %vm56_vm2 = vcmp.eq.s32.totalorder %v1775_v50, %v52_v49 }
  0x9f   :  { %v60_v51 = vpop.permute.xlu0 %59 }
  0xa0   :  { %vm64_vm3 = vcmp.eq.s32.totalorder %v1775_v50, %v60_v51 }
  0xa1   :  { %vm66_vm4 = vmor %vm56_vm2, %vm64_vm3  ;;  %vm1358_vm2 = vcmask 130048   ;;  %vm1360_vm3 = vcmask 162816  }
  0xa2   :  { %vm69_vm6 = vmor %vm66_vm4, %vm68_vm1  ;;  %vm1362_vm4 = vcmask 195584  }
  0xa3   :  { %v1384_v52 = vsel %vm69_vm6, 1.0, %v1653_v9  ;;  %vm1366_vm6 = vcmask 254976  }
  0xa4   :  { %1386 = vmatmul.mubr.msk.f32.vlgmr.msra.gmra.mxu0 %vm101_vm5, %v1384_v52 }
  0xa5   :  { %178 = vmatprep.mubr.f32.mxu0 %v1653_v9  ;;  %439 = vmatpush1.msra.mxu0 %v1702_v11 }
  0xa6   :  { %440 = vmatprep.subr.mxu0 %v1704_v14 }
  0xa7   :  { %441 = vmatpush1.msra.mxu0 %v1706_v16  ;;  %v296_v3 = vpop.permute.xlu1 %295 }
  0xa8   :  { %442 = vmatprep.subr.mxu0 %v1709_v18 }
  0xa9   :  { %443 = vmatpush1.msra.mxu0 %v1712_v20 }
  0xaa   :  { %444 = vmatprep.subr.mxu0 %v1715_v22 }
  0xab   :  { %445 = vmatpush1.msra.mxu0 %v1718_v24 }
  0xac   :  { %446 = vmatprep.subr.mxu0 %v1721_v26 }
  0xad   :  { %447 = vmatpush1.msra.mxu0 %v1724_v28 }
  0xae   :  { %448 = vmatprep.subr.mxu0 %v1727_v30 }
  0xaf   :  { %449 = vmatpush1.msra.mxu0 %v1730_v32 }
  0xb0   :  { %450 = vmatprep.subr.mxu0 %v1733_v34 }
  0xb1   :  { %451 = vmatpush1.msra.mxu0 %v1736_v36 }
  0xb2   :  { %452 = vmatprep.subr.mxu0 %v1739_v38 }
  0xb3   :  { %453 = vmatpush1.msra.mxu0 %v1742_v40 }
  0xb4   :  { %658 = vmatprep.subr.mxu0 %v1698_v8 }
  0xf3   :  { %v274_v53 = vpop.f32.mrf.mxu1 }
  0xf5   :  { %v276_v58 = vpop.f32.mrf.mxu1 }
 0x164   :  { %v1801_v54 = vpop.f32.mrf.mxu0 }
 0x165   :  { %v279_v55 = vadd.f32 %v274_v53, %v1801_v54 }
 0x166   :  { %v1804_v57 = vpop.f32.mrf.mxu0 }
 0x167   :  { %v1390_v56 = vmul.f32 -1.442695, %v279_v55  ;;  %v280_v59 = vadd.f32 %v276_v58, %v1804_v57 }
 0x169   :  { %1484 = vpow2.f32 %v1390_v56  ;;  %v1391_v1 = vmul.f32 -1.442695, %v280_v59 }
 0x16a   :  { %1486 = vtanh.f32 %v280_v59 }
 0x176   :  { %v1485_v60 = vpop.eup %1484 }
 0x177   :  { %v287_v61 = vadd.f32 1.0, %v1485_v60  ;;  %v1487_v62 = vpop.eup %1486 }
 0x179   :  { %1488 = vrcp.f32 %v287_v61 }
 0x17a   :  { %1490 = vpow2.f32 %v1391_v1 }
 0x186   :  { %v1489_v63 = vpop.eup %1488 }
 0x187   :  { %v299_v0 = vmul.f32 %v1489_v63, %v1487_v62  ;;  %v1491_v2 = vpop.eup %1490  ;;  %v298_v5 = vmul.f32 %v1489_v63, %v296_v3 }
 0x188   :  { %v288_v4 = vadd.f32 1.0, %v1491_v2 }
 0x189   :  { %301 = vrot.lane.b32.xlu1 %v299_v0, %s1655_s7 }
 0x18a   :  { %1492 = vrcp.f32 %v288_v4 }
 0x197   :  { %v1493_v10 = vpop.eup %1492 }
 0x1fb   :  { %v302_v6 = vpop.permute.xlu1 %301 }
 0x1fc   :  { %v304_v7 = vadd.f32 %v302_v6, %v298_v5 }
 0x1fe   :  { %1494 = vtanh.f32 %v304_v7  ;;  %v405_v39 = vrot.slane %v304_v7, 6 }
 0x20b   :  { %v1495_v12 = vpop.eup %1494 }
 0x20c   :  { %v1808_v13 = vmul.f32 %v1495_v12, %v1493_v10 }
 0x20e   :  { %308 = vrot.lane.b32.xlu1 %v1808_v13, %s1655_s7 }
 0x212   :  { %54 = vperm.xlu1 %1483, %v47_v17  }
 0x280   :  { %v1812_v15 = vpop.permute.xlu1 %308 }
 0x281   :  { %1392 = vmatmul.mubr.msk.f32.vlgmr.msra.gmra.mxu1 %vm204_vm0, %v1812_v15 }
 0x282   :  { %549 = vmatpush1.msra.mxu1 %v1702_v11  ;;  %596 = vmatprep.mubr.f32.mxu1 %v1653_v9 }
 0x283   :  { %550 = vmatprep.subr.mxu1 %v1704_v14 }
 0x284   :  { %551 = vmatpush1.msra.mxu1 %v1706_v16 }
 0x285   :  { %552 = vmatprep.subr.mxu1 %v1709_v18 }
 0x286   :  { %553 = vmatpush1.msra.mxu1 %v1712_v20 }
 0x287   :  { %554 = vmatprep.subr.mxu1 %v1715_v22 }
 0x288   :  { %555 = vmatpush1.msra.mxu1 %v1718_v24 }
 0x289   :  { %556 = vmatprep.subr.mxu1 %v1721_v26 }
 0x28a   :  { %557 = vmatpush1.msra.mxu1 %v1724_v28 }
 0x28b   :  { %558 = vmatprep.subr.mxu1 %v1727_v30 }
 0x28c   :  { %559 = vmatpush1.msra.mxu1 %v1730_v32 }
 0x28d   :  { %560 = vmatprep.subr.mxu1 %v1733_v34  ;;  %v55_v49 = vpop.permute.xlu1 %54 }
 0x28e   :  { %561 = vmatpush1.msra.mxu1 %v1736_v36  ;;  %vm57_vm7 = vcmp.eq.s32.totalorder %v1775_v50, %v55_v49 }
 0x28f   :  { %562 = vmatprep.subr.mxu1 %v1739_v38 }
 0x290   :  { %563 = vmatpush1.msra.mxu1 %v1742_v40 }
 0x291   :  { %761 = vmatprep.subr.mxu1 %v1698_v8 }
 0x341   :  { %v378_v19 = vpop.f32.mrf.mxu1 }
 0x342   :  { %v385_v21 = vrot.slane %v378_v19, 6 }
 0x343   :  { %v380_v27 = vpop.f32.mrf.mxu1 }
 0x344   :  { %v389_v23 = vadd.f32 %v385_v21, %v1801_v54  ;;  %v386_v29 = vrot.slane %v380_v27, 6 }
 0x346   :  { %v1393_v25 = vmul.f32 -1.442695, %v389_v23  ;;  %v390_v31 = vadd.f32 %v386_v29, %v1804_v57 }
 0x348   :  { %1496 = vpow2.f32 %v1393_v25  ;;  %v1394_v44 = vmul.f32 -1.442695, %v390_v31 }
 0x349   :  { %1498 = vtanh.f32 %v390_v31 }
 0x355   :  { %v1497_v33 = vpop.eup %1496 }
 0x356   :  { %v397_v35 = vadd.f32 1.0, %v1497_v33  ;;  %v1499_v37 = vpop.eup %1498 }
 0x358   :  { %1500 = vrcp.f32 %v397_v35 }
 0x359   :  { %1502 = vpow2.f32 %v1394_v44 }
 0x365   :  { %v1501_v41 = vpop.eup %1500 }
 0x366   :  { %v408_v42 = vmul.f32 %v1501_v41, %v1499_v37  ;;  %v407_v43 = vmul.f32 %v1501_v41, %v405_v39  ;;  %v1503_v45 = vpop.eup %1502 }
 0x367   :  { %v398_v46 = vadd.f32 1.0, %v1503_v45 }
 0x368   :  { %410 = vrot.lane.b32.xlu0 %v408_v42, %s1655_s7 }
 0x369   :  { %1504 = vrcp.f32 %v398_v46 }
 0x36c   :  { %62 = vperm.xlu0 %1482, %v47_v17  }
 0x376   :  { %v1505_v52 = vpop.eup %1504 }
 0x3da   :  { %v411_v47 = vpop.permute.xlu0 %410 }
 0x3db   :  { %v413_v48 = vadd.f32 %v411_v47, %v407_v43 }
 0x3dd   :  { %1506 = vtanh.f32 %v413_v48  ;;  %v515_v7 = vrot.slane %v413_v48, 6 }
 0x3e7   :  { %v63_v51 = vpop.permute.xlu0 %62 }
 0x3e8   :  { %vm65_vm8 = vcmp.eq.s32.totalorder %v1775_v50, %v63_v51 }
 0x3e9   :  { %vm67_vm9 = vmor %vm57_vm7, %vm65_vm8 }
 0x3ea   :  { %v1507_v53 = vpop.eup %1506  ;;  %vm70_vm10 = vmor %vm67_vm9, %vm68_vm1  ;;  %vm1356_vm1 = vcmask 97280  }
 0x3eb   :  { %v1385_v55 = vsel %vm70_vm10, 1.0, %v1653_v9  ;;  %v1844_v56 = vmul.f32 %v1507_v53, %v1505_v52 }
 0x3ec   :  { %1387 = vmatmul.mubr.msk.f32.gmra.mxu0 %vm101_vm5, %v1385_v55  ;;  %vm1364_vm5 = vcmask 228352  }
 0x3ed   :  { %v417_v58 = vrot.slane %v1844_v56, 2  ;;  %486 = vmatprep.mubr.f32.mxu0 %v1653_v9 }
 0x3ef   :  { %418 = vrot.lane.b32.xlu1 %v417_v58, %s1655_s7 }
 0x461   :  { %v419_v59 = vpop.permute.xlu1 %418 }
 0x462   :  { %1395 = vmatmul.mubr.msk.f32.vlgmr.msra.gmra.mxu0 %vm204_vm0, %v419_v59 }
 0x463   :  { %659 = vmatpush1.msra.mxu0 %v1702_v11  ;;  %706 = vmatprep.mubr.f32.mxu0 %v1653_v9 }
 0x464   :  { %660 = vmatprep.subr.mxu0 %v1704_v14 }
 0x465   :  { %661 = vmatpush1.msra.mxu0 %v1706_v16 }
 0x466   :  { %662 = vmatprep.subr.mxu0 %v1709_v18 }
 0x467   :  { %663 = vmatpush1.msra.mxu0 %v1712_v20 }
 0x468   :  { %664 = vmatprep.subr.mxu0 %v1715_v22 }
 0x469   :  { %665 = vmatpush1.msra.mxu0 %v1718_v24 }
 0x46a   :  { %666 = vmatprep.subr.mxu0 %v1721_v26 }
 0x46b   :  { %667 = vmatpush1.msra.mxu0 %v1724_v28 }
 0x46c   :  { %668 = vmatprep.subr.mxu0 %v1727_v30 }
 0x46d   :  { %669 = vmatpush1.msra.mxu0 %v1730_v32 }
 0x46e   :  { %670 = vmatprep.subr.mxu0 %v1733_v34 }
 0x46f   :  { %671 = vmatpush1.msra.mxu0 %v1736_v36 }
 0x470   :  { %672 = vmatprep.subr.mxu0 %v1739_v38 }
 0x471   :  { %673 = vmatpush1.msra.mxu0 %v1742_v40 }
 0x472   :  { %871 = vmatprep.subr.mxu0 %v1698_v8 }
 0x4ac   :  { %v1868_v50 = vpop.f32.mrf.mxu0 }
 0x4ae   :  { %v1870_v60 = vpop.f32.mrf.mxu0 }
 0x522   :  { %v488_v61 = vpop.f32.mrf.mxu0 }
 0x523   :  { %v495_v62 = vrot.slane %v488_v61, 4 }
 0x524   :  { %v490_v1 = vpop.f32.mrf.mxu0 }
 0x525   :  { %v499_v63 = vadd.f32 %v495_v62, %v1801_v54  ;;  %v496_v2 = vrot.slane %v490_v1, 4 }
 0x527   :  { %v1396_v0 = vmul.f32 -1.442695, %v499_v63  ;;  %v500_v3 = vadd.f32 %v496_v2, %v1804_v57 }
 0x529   :  { %1508 = vpow2.f32 %v1396_v0  ;;  %v1397_v19 = vmul.f32 -1.442695, %v500_v3 }
 0x52a   :  { %1510 = vtanh.f32 %v500_v3 }
 0x536   :  { %v1509_v4 = vpop.eup %1508 }
 0x537   :  { %v507_v5 = vadd.f32 1.0, %v1509_v4  ;;  %v1511_v6 = vpop.eup %1510 }
 0x539   :  { %1512 = vrcp.f32 %v507_v5 }
 0x53a   :  { %1514 = vpow2.f32 %v1397_v19 }
 0x546   :  { %v1513_v10 = vpop.eup %1512 }
 0x547   :  { %v518_v12 = vmul.f32 %v1513_v10, %v1511_v6  ;;  %v517_v17 = vmul.f32 %v1513_v10, %v515_v7  ;;  %v1515_v21 = vpop.eup %1514 }
 0x548   :  { %v508_v23 = vadd.f32 1.0, %v1515_v21 }
 0x549   :  { %520 = vrot.lane.b32.xlu0 %v518_v12, %s1655_s7 }
 0x54a   :  { %1516 = vrcp.f32 %v508_v23 }
 0x557   :  { %v1517_v29 = vpop.eup %1516 }
 0x5bb   :  { %v521_v25 = vpop.permute.xlu0 %520 }
 0x5bc   :  { %v523_v27 = vadd.f32 %v521_v25, %v517_v17 }
 0x5be   :  { %1518 = vtanh.f32 %v523_v27  ;;  %v625_v51 = vrot.slane %v523_v27, 6 }
 0x5cb   :  { %v1519_v31 = vpop.eup %1518 }
 0x5cc   :  { %v1875_v33 = vmul.f32 %v1519_v31, %v1517_v29 }
 0x5ce   :  { %v527_v35 = vrot.slane %v1875_v33, 4 }
 0x5d0   :  { %528 = vrot.lane.b32.xlu1 %v527_v35, %s1655_s7 }
 0x642   :  { %v529_v37 = vpop.permute.xlu1 %528 }
 0x643   :  { %1398 = vmatmul.mubr.msk.f32.vlgmr.msra.gmra.mxu1 %vm204_vm0, %v529_v37 }
 0x644   :  { %762 = vmatpush1.msra.mxu1 %v1702_v11  ;;  %809 = vmatprep.mubr.f32.mxu1 %v1653_v9 }
 0x645   :  { %763 = vmatprep.subr.mxu1 %v1704_v14 }
 0x646   :  { %764 = vmatpush1.msra.mxu1 %v1706_v16 }
 0x647   :  { %765 = vmatprep.subr.mxu1 %v1709_v18 }
 0x648   :  { %766 = vmatpush1.msra.mxu1 %v1712_v20 }
 0x649   :  { %767 = vmatprep.subr.mxu1 %v1715_v22 }
 0x64a   :  { %768 = vmatpush1.msra.mxu1 %v1718_v24 }
 0x64b   :  { %769 = vmatprep.subr.mxu1 %v1721_v26 }
 0x64c   :  { %770 = vmatpush1.msra.mxu1 %v1724_v28 }
 0x64d   :  { %771 = vmatprep.subr.mxu1 %v1727_v30 }
 0x64e   :  { %772 = vmatpush1.msra.mxu1 %v1730_v32 }
 0x64f   :  { %773 = vmatprep.subr.mxu1 %v1733_v34 }
 0x650   :  { %774 = vmatpush1.msra.mxu1 %v1736_v36 }
 0x651   :  { %775 = vmatprep.subr.mxu1 %v1739_v38 }
 0x652   :  { %776 = vmatpush1.msra.mxu1 %v1742_v40 }
 0x653   :  { %981 = vmatprep.subr.mxu1 %v1698_v8 }
 0x703   :  { %v598_v39 = vpop.f32.mrf.mxu1 }
 0x704   :  { %v605_v41 = vrot.slane %v598_v39, 2 }
 0x705   :  { %v600_v44 = vpop.f32.mrf.mxu1 }
 0x706   :  { %v609_v42 = vadd.f32 %v605_v41, %v1801_v54  ;;  %v606_v45 = vrot.slane %v600_v44, 2 }
 0x708   :  { %v1399_v43 = vmul.f32 -1.442695, %v609_v42  ;;  %v610_v46 = vadd.f32 %v606_v45, %v1804_v57 }
 0x70a   :  { %1520 = vpow2.f32 %v1399_v43  ;;  %v1400_v8 = vmul.f32 -1.442695, %v610_v46 }
 0x70b   :  { %1522 = vtanh.f32 %v610_v46 }
 0x717   :  { %v1521_v47 = vpop.eup %1520 }
 0x718   :  { %v617_v48 = vadd.f32 1.0, %v1521_v47  ;;  %v1523_v49 = vpop.eup %1522 }
 0x71a   :  { %1524 = vrcp.f32 %v617_v48 }
 0x71b   :  { %1526 = vpow2.f32 %v1400_v8 }
 0x727   :  { %v1525_v52 = vpop.eup %1524 }
 0x728   :  { %v628_v53 = vmul.f32 %v1525_v52, %v1523_v49  ;;  %v627_v55 = vmul.f32 %v1525_v52, %v625_v51  ;;  %v1527_v54 = vpop.eup %1526 }
 0x729   :  { %v618_v58 = vadd.f32 1.0, %v1527_v54 }
 0x72a   :  { %630 = vrot.lane.b32.xlu0 %v628_v53, %s1655_s7 }
 0x72b   :  { %1528 = vrcp.f32 %v618_v58 }
 0x738   :  { %v1529_v57 = vpop.eup %1528 }
 0x79c   :  { %v631_v59 = vpop.permute.xlu0 %630 }
 0x79d   :  { %v633_v61 = vadd.f32 %v631_v59, %v627_v55 }
 0x79f   :  { %1530 = vtanh.f32 %v633_v61  ;;  %v729_v17 = vrot.slane %v633_v61, 6 }
 0x7ac   :  { %v1531_v62 = vpop.eup %1530 }
 0x7ad   :  { %v1900_v63 = vmul.f32 %v1531_v62, %v1529_v57 }
 0x7af   :  { %v637_v0 = vrot.slane %v1900_v63, 6 }
 0x7b1   :  { %638 = vrot.lane.b32.xlu1 %v637_v0, %s1655_s7 }
 0x823   :  { %v1904_v1 = vpop.permute.xlu1 %638 }
 0x824   :  { %1401 = vmatmul.mubr.msk.f32.vlgmr.msra.gmra.mxu0 %vm204_vm0, %v1904_v1 }
 0x825   :  { %872 = vmatpush1.msra.mxu0 %v1702_v11  ;;  %919 = vmatprep.mubr.f32.mxu0 %v1653_v9 }
 0x826   :  { %873 = vmatprep.subr.mxu0 %v1704_v14 }
 0x827   :  { %874 = vmatpush1.msra.mxu0 %v1706_v16 }
 0x828   :  { %875 = vmatprep.subr.mxu0 %v1709_v18 }
 0x829   :  { %876 = vmatpush1.msra.mxu0 %v1712_v20 }
 0x82a   :  { %877 = vmatprep.subr.mxu0 %v1715_v22 }
 0x82b   :  { %878 = vmatpush1.msra.mxu0 %v1718_v24 }
 0x82c   :  { %879 = vmatprep.subr.mxu0 %v1721_v26 }
 0x82d   :  { %880 = vmatpush1.msra.mxu0 %v1724_v28 }
 0x82e   :  { %881 = vmatprep.subr.mxu0 %v1727_v30 }
 0x82f   :  { %882 = vmatpush1.msra.mxu0 %v1730_v32 }
 0x830   :  { %883 = vmatprep.subr.mxu0 %v1733_v34 }
 0x831   :  { %884 = vmatpush1.msra.mxu0 %v1736_v36 }
 0x832   :  { %885 = vmatprep.subr.mxu0 %v1739_v38 }
 0x833   :  { %886 = vmatpush1.msra.mxu0 %v1742_v40 }
 0x8e4   :  { %v708_v2 = vpop.f32.mrf.mxu0 }
 0x8e5   :  { %v713_v3 = vadd.f32 %v708_v2, %v1868_v50 }
 0x8e6   :  { %v710_v5 = vpop.f32.mrf.mxu0 }
 0x8e7   :  { %v1402_v4 = vmul.f32 -1.442695, %v713_v3  ;;  %v714_v6 = vadd.f32 %v710_v5, %v1870_v60 }
 0x8e9   :  { %1532 = vpow2.f32 %v1402_v4  ;;  %v1403_v25 = vmul.f32 -1.442695, %v714_v6 }
 0x8ea   :  { %1534 = vtanh.f32 %v714_v6 }
 0x8f6   :  { %v1533_v7 = vpop.eup %1532 }
 0x8f7   :  { %v721_v10 = vadd.f32 1.0, %v1533_v7  ;;  %v1535_v12 = vpop.eup %1534 }
 0x8f9   :  { %1536 = vrcp.f32 %v721_v10 }
 0x8fa   :  { %1538 = vpow2.f32 %v1403_v25 }
 0x906   :  { %v1537_v19 = vpop.eup %1536 }
 0x907   :  { %v732_v21 = vmul.f32 %v1537_v19, %v1535_v12  ;;  %v731_v23 = vmul.f32 %v1537_v19, %v729_v17  ;;  %v1539_v27 = vpop.eup %1538 }
 0x908   :  { %v722_v29 = vadd.f32 1.0, %v1539_v27 }
 0x909   :  { %734 = vrot.lane.b32.xlu0 %v732_v21, %s1655_s7 }
 0x90a   :  { %1540 = vrcp.f32 %v722_v29  ;;  %v1107_v29 = vrot.slane %v1875_v33, 2 }
 0x917   :  { %v1541_v37 = vpop.eup %1540 }
 0x97b   :  { %v735_v31 = vpop.permute.xlu0 %734 }
 0x97c   :  { %v737_v35 = vadd.f32 %v735_v31, %v731_v23 }
 0x97e   :  { %1542 = vtanh.f32 %v737_v35 }
 0x98b   :  { %v1543_v39 = vpop.eup %1542 }
 0x98c   :  { %v1927_v41 = vmul.f32 %v1543_v39, %v1541_v37 }
 0x98e   :  { %741 = vrot.lane.b32.xlu1 %v1927_v41, %s1655_s7  ;;  %v1096_v31 = vrot.slane %v1927_v41, 2 }
 0xa00   :  { %v1931_v42 = vpop.permute.xlu1 %741 }
 0xa01   :  { %1404 = vmatmul.mubr.msk.f32.vlgmr.msra.gmra.mxu1 %vm204_vm0, %v1931_v42 }
 0xa02   :  { %982 = vmatpush1.msra.mxu1 %v1702_v11  ;;  %1029 = vmatprep.mubr.f32.mxu1 %v1653_v9 }
 0xa03   :  { %983 = vmatprep.subr.mxu1 %v1704_v14 }
 0xa04   :  { %984 = vmatpush1.msra.mxu1 %v1706_v16 }
 0xa05   :  { %985 = vmatprep.subr.mxu1 %v1709_v18 }
 0xa06   :  { %986 = vmatpush1.msra.mxu1 %v1712_v20 }
 0xa07   :  { %987 = vmatprep.subr.mxu1 %v1715_v22 }
 0xa08   :  { %988 = vmatpush1.msra.mxu1 %v1718_v24 }
 0xa09   :  { %989 = vmatprep.subr.mxu1 %v1721_v26 }
 0xa0a   :  { %990 = vmatpush1.msra.mxu1 %v1724_v28 }
 0xa0b   :  { %991 = vmatprep.subr.mxu1 %v1727_v30  ;;  %v838_v30 = vrot.slane %v737_v35, 6  ;;  %v1115_v35 = vrot.slane %v1844_v56, 6 }
 0xa0c   :  { %992 = vmatpush1.msra.mxu1 %v1730_v32 }
 0xa0d   :  { %993 = vmatprep.subr.mxu1 %v1733_v34 }
 0xa0e   :  { %994 = vmatpush1.msra.mxu1 %v1736_v36 }
 0xa0f   :  { %995 = vmatprep.subr.mxu1 %v1739_v38 }
 0xa10   :  { %996 = vmatpush1.msra.mxu1 %v1742_v40 }
 0xac1   :  { %v811_v9 = vpop.f32.mrf.mxu1 }
 0xac2   :  { %v818_v11 = vrot.slane %v811_v9, 6 }
 0xac3   :  { %v813_v18 = vpop.f32.mrf.mxu1 }
 0xac4   :  { %v822_v14 = vadd.f32 %v818_v11, %v1868_v50  ;;  %v819_v20 = vrot.slane %v813_v18, 6 }
 0xac6   :  { %v1405_v16 = vmul.f32 -1.442695, %v822_v14  ;;  %v823_v22 = vadd.f32 %v819_v20, %v1870_v60 }
 0xac8   :  { %1544 = vpow2.f32 %v1405_v16  ;;  %v1406_v38 = vmul.f32 -1.442695, %v823_v22 }
 0xac9   :  { %1546 = vtanh.f32 %v823_v22 }
 0xad5   :  { %v1545_v24 = vpop.eup %1544 }
 0xad6   :  { %v830_v26 = vadd.f32 1.0, %v1545_v24  ;;  %v1547_v28 = vpop.eup %1546 }
 0xad8   :  { %1548 = vrcp.f32 %v830_v26 }
 0xad9   :  { %1550 = vpow2.f32 %v1406_v38 }
 0xae5   :  { %v1549_v32 = vpop.eup %1548 }
 0xae6   :  { %v841_v34 = vmul.f32 %v1549_v32, %v1547_v28  ;;  %v840_v36 = vmul.f32 %v1549_v32, %v838_v30  ;;  %v1551_v40 = vpop.eup %1550 }
 0xae7   :  { %v831_v43 = vadd.f32 1.0, %v1551_v40 }
 0xae8   :  { %843 = vrot.lane.b32.xlu0 %v841_v34, %s1655_s7  ;;  %v1143_v34 = vld [vmem:[#allocation5 + $0x30] sm:$0xff] }
 0xae9   :  { %1552 = vrcp.f32 %v831_v43 }
 0xaf6   :  { %v1553_v46 = vpop.eup %1552 }
 0xb5a   :  { %v844_v44 = vpop.permute.xlu0 %843 }
 0xb5b   :  { %v846_v45 = vadd.f32 %v844_v44, %v840_v36  ;;  %v1141_v36 = vld [vmem:[#allocation5 + $0x20] sm:$0xff]  ;;  %v1140_v44 = vld [vmem:[#allocation5 + $0x18] sm:$0xff] }
 0xb5d   :  { %1554 = vtanh.f32 %v846_v45  ;;  %v948_v0 = vrot.slane %v846_v45, 6  ;;  %v1139_v45 = vld [vmem:[#allocation5 + $0x10] sm:$0xff] }
 0xb6a   :  { %v1555_v47 = vpop.eup %1554 }
 0xb6b   :  { %v1954_v48 = vmul.f32 %v1555_v47, %v1553_v46  ;;  %v1137_v46 = vld [vmem:[#allocation5] sm:$0xff] }
 0xb6d   :  { %v850_v49 = vrot.slane %v1954_v48, 2  ;;  %v1088_v27 = vrot.slane %v1954_v48, 6 }
 0xb6f   :  { %851 = vrot.lane.b32.xlu1 %v850_v49, %s1655_s7 }
 0xbe1   :  { %v852_v51 = vpop.permute.xlu1 %851 }
 0xbe2   :  { %1407 = vmatmul.mubr.msk.f32.vlgmr.msra.gmra.mxu0 %vm204_vm0, %v852_v51 }
 0xca2   :  { %v921_v52 = vpop.f32.mrf.mxu0 }
 0xca3   :  { %v928_v53 = vrot.slane %v921_v52, 4  ;;  %v1123_v52 = vrot.slane %v1808_v13, 2 }
 0xca4   :  { %v923_v54 = vpop.f32.mrf.mxu0 }
 0xca5   :  { %v932_v55 = vadd.f32 %v928_v53, %v1868_v50  ;;  %v929_v58 = vrot.slane %v923_v54, 4 }
 0xca7   :  { %v1408_v8 = vmul.f32 -1.442695, %v932_v55  ;;  %v933_v59 = vadd.f32 %v929_v58, %v1870_v60 }
 0xca9   :  { %1556 = vpow2.f32 %v1408_v8  ;;  %v1409_v5 = vmul.f32 -1.442695, %v933_v59 }
 0xcaa   :  { %1558 = vtanh.f32 %v933_v59 }
 0xcb6   :  { %v1557_v61 = vpop.eup %1556 }
 0xcb7   :  { %v940_v57 = vadd.f32 1.0, %v1557_v61  ;;  %v1559_v62 = vpop.eup %1558 }
 0xcb9   :  { %1560 = vrcp.f32 %v940_v57 }
 0xcba   :  { %1562 = vpow2.f32 %v1409_v5 }
 0xcc6   :  { %v1561_v2 = vpop.eup %1560 }
 0xcc7   :  { %v951_v3 = vmul.f32 %v1561_v2, %v1559_v62  ;;  %v950_v4 = vmul.f32 %v1561_v2, %v948_v0  ;;  %v1563_v6 = vpop.eup %1562 }
 0xcc8   :  { %v941_v7 = vadd.f32 1.0, %v1563_v6 }
 0xcc9   :  { %953 = vrot.lane.b32.xlu0 %v951_v3, %s1655_s7 }
 0xcca   :  { %1564 = vrcp.f32 %v941_v7 }
 0xcd7   :  { %v1565_v17 = vpop.eup %1564 }
 0xd3b   :  { %v954_v10 = vpop.permute.xlu0 %953 }
 0xd3c   :  { %v956_v12 = vadd.f32 %v954_v10, %v950_v4  ;;  %v1103_v10 = vsel %vm1075_vm11, %v1931_v42, %v1904_v1  ;;  %v1147_v1 = vld [vmem:[#allocation5 + $0x50] sm:$0xff]  ;;  %v1146_v42 = vld [vmem:[#allocation5 + $0x48] sm:$0xff] }
 0xd3e   :  { %1566 = vtanh.f32 %v956_v12  ;;  %v1058_v26 = vrot.slane %v956_v12, 6 }
 0xd4b   :  { %v1567_v19 = vpop.eup %1566 }
 0xd4c   :  { %v958_v21 = vmul.f32 %v1567_v19, %v1565_v17 }
 0xd4e   :  { %v960_v23 = vrot.slane %v958_v21, 4  ;;  %v1080_v25 = vrot.slane %v958_v21, 2 }
 0xd50   :  { %961 = vrot.lane.b32.xlu1 %v960_v23, %s1655_s7 }
 0xd54   :  { %1081 = vrot.lane.b32.xlu1 %v1080_v25, %s1655_s7 }
 0xd58   :  { %1089 = vrot.lane.b32.xlu1 %v1088_v27, %s1655_s7 }
 0xd5c   :  { %1108 = vrot.lane.b32.xlu1 %v1107_v29, %s1655_s7 }
 0xd60   :  { %1097 = vrot.lane.b32.xlu1 %v1096_v31, %s1655_s7  ;;  %v1149_v31 = vld [vmem:[#allocation5 + $0x60] sm:$0xff] }
 0xd61   :  { %1454 = vmatprep.subr.mxu1 %v1149_v31 }
 0xd64   :  { %1116 = vrot.lane.b32.xlu1 %v1115_v35, %s1655_s7  ;;  %v1148_v35 = vld [vmem:[#allocation5 + $0x58] sm:$0xff] }
 0xdc2   :  { %v962_v37 = vpop.permute.xlu1 %961 }
 0xdc3   :  { %1410 = vmatmul.mubr.msk.f32.vlgmr.msra.gmra.mxu1 %vm204_vm0, %v962_v37  ;;  %v1413_v37 = vld [vmem:[#allocation5 + $0x40] ss:$0 sm:$0xff] }
 0xdc4   :  { %1455 = vmatpush3.msra.mxu1 %v1149_v31 }
 0xdc5   :  { %1456 = vmatprep.subr.mxu1 %v1148_v35 }
 0xdc6   :  { %v1082_v53 = vpop.permute.xlu1 %1081  ;;  %1457 = vmatpush3.msra.mxu1 %v1148_v35 }
 0xdc7   :  { %1458 = vmatprep.subr.mxu1 %v1147_v1 }
 0xdc8   :  { %1459 = vmatpush3.msra.mxu1 %v1147_v1 }
 0xdc9   :  { %1460 = vmatprep.subr.mxu1 %v1146_v42 }
 0xdca   :  { %v1090_v8 = vpop.permute.xlu1 %1089  ;;  %1461 = vmatpush3.msra.mxu1 %v1146_v42 }
 0xdce   :  { %v1109_v58 = vpop.permute.xlu1 %1108 }
 0xdd2   :  { %v1098_v61 = vpop.permute.xlu1 %1097 }
 0xdd6   :  { %v1117_v62 = vpop.permute.xlu1 %1116 }
 0xe83   :  { %v1031_v39 = vpop.f32.mrf.mxu1 }
 0xe84   :  { %v1038_v9 = vrot.slane %v1031_v39, 2 }
 0xe85   :  { %v1033_v16 = vpop.f32.mrf.mxu1 }
 0xe86   :  { %v1042_v11 = vadd.f32 %v1038_v9, %v1868_v50  ;;  %v1039_v18 = vrot.slane %v1033_v16, 2  ;;  %v1144_v50 = vld [vmem:[#allocation5 + $0x38] sm:$0xff] }
 0xe87   :  { %1435 = vmatprep.subr.mxu0 %v1144_v50 }
 0xe88   :  { %v1411_v14 = vmul.f32 -1.442695, %v1042_v11  ;;  %v1043_v20 = vadd.f32 %v1039_v18, %v1870_v60  ;;  %1436 = vmatpush3.msra.mxu0 %v1144_v50  ;;  %v1142_v60 = vld [vmem:[#allocation5 + $0x28] sm:$0xff] }
 0xe89   :  { %1437 = vmatprep.subr.mxu0 %v1143_v34 }
 0xe8a   :  { %1568 = vpow2.f32 %v1411_v14  ;;  %1438 = vmatpush3.msra.mxu0 %v1143_v34 }
 0xe8b   :  { %1570 = vtanh.f32 %v1043_v20  ;;  %1439 = vmatprep.subr.mxu0 %v1142_v60 }
 0xe8c   :  { %1440 = vmatpush3.msra.mxu0 %v1142_v60 }
 0xe8d   :  { %1441 = vmatprep.subr.mxu0 %v1141_v36 }
 0xe8e   :  { %1442 = vmatpush3.msra.mxu0 %v1141_v36 }
 0xe8f   :  { %1443 = vmatprep.subr.mxu0 %v1140_v44 }
 0xe90   :  { %1444 = vmatpush3.msra.mxu0 %v1140_v44 }
 0xe91   :  { %1445 = vmatprep.subr.mxu0 %v1139_v45 }
 0xe92   :  { %1446 = vmatpush3.msra.mxu0 %v1139_v45 }
 0xe97   :  { %v1569_v41 = vpop.eup %1568 }
 0xe98   :  { %v1050_v22 = vadd.f32 1.0, %v1569_v41  ;;  %v1571_v24 = vpop.eup %1570 }
 0xe9a   :  { %1572 = vrcp.f32 %v1050_v22 }
 0xea7   :  { %v1573_v28 = vpop.eup %1572 }
 0xea8   :  { %v1061_v30 = vmul.f32 %v1573_v28, %v1571_v24  ;;  %v1060_v32 = vmul.f32 %v1573_v28, %v1058_v26 }
 0xeaa   :  { %1063 = vrot.lane.b32.xlu0 %v1061_v30, %s1655_s7 }
 0xeae   :  { %1077 = vrot.lane.b32.xlu0 %v1844_v56, %s1655_s7  ;;  %v1412_v56 = vmul.f32 -1.442695, %v1043_v20  ;;  %v1416_v20 = vld [vmem:[#allocation5 + $0x68] ss:$0 sm:$0xff] }
 0xeb0   :  { %1574 = vpow2.f32 %v1412_v56 }
 0xeb2   :  { %1085 = vrot.lane.b32.xlu0 %v1875_v33, %s1655_s7 }
 0xeb6   :  { %1104 = vrot.lane.b32.xlu0 %v1954_v48, %s1655_s7 }
 0xeba   :  { %1093 = vrot.lane.b32.xlu0 %v1900_v63, %s1655_s7  ;;  %v1138_v63 = vld [vmem:[#allocation5 + $0x8] sm:$0xff] }
 0xebb   :  { %1447 = vmatprep.subr.mxu0 %v1138_v63 }
 0xebc   :  { %1448 = vmatpush3.msra.mxu0 %v1138_v63 }
 0xebd   :  { %v1575_v33 = vpop.eup %1574  ;;  %1449 = vmatprep.subr.mxu0 %v1137_v46 }
 0xebe   :  { %1112 = vrot.lane.b32.xlu0 %v958_v21, %s1655_s7  ;;  %v1051_v38 = vadd.f32 1.0, %v1575_v33  ;;  %1450 = vmatpush3.msra.mxu0 %v1137_v46 }
 0xec0   :  { %1576 = vrcp.f32 %v1051_v38 }
 0xecd   :  { %v1577_v47 = vpop.eup %1576 }
 0xf1c   :  { %v1064_v40 = vpop.permute.xlu0 %1063 }
 0xf1d   :  { %v1066_v43 = vadd.f32 %v1064_v40, %v1060_v32 }
 0xf1f   :  { %1578 = vtanh.f32 %v1066_v43 }
 0xf20   :  { %v1078_v55 = vpop.permute.xlu0 %1077 }
 0xf21   :  { %v1084_v3 = vsel %vm1075_vm11, %v1078_v55, %v1082_v53 }
 0xf24   :  { %v1086_v54 = vpop.permute.xlu0 %1085 }
 0xf25   :  { %v1092_v5 = vsel %vm1075_vm11, %v1086_v54, %v1090_v8 }
 0xf28   :  { %v1105_v59 = vpop.permute.xlu0 %1104 }
 0xf29   :  { %v1111_v4 = vsel %vm1075_vm11, %v1105_v59, %v1109_v58 }
 0xf2a   :  { %v1134_v19 = vsel %vm1128_vm12, %v1103_v10, %v1111_v4 }
 0xf2c   :  { %v1579_v48 = vpop.eup %1578  ;;  %v1094_v57 = vpop.permute.xlu0 %1093 }
 0xf2d   :  { %v1068_v49 = vmul.f32 %v1579_v48, %v1577_v47  ;;  %v1100_v12 = vsel %vm1075_vm11, %v1094_v57, %v1098_v61 }
 0xf2f   :  { %1120 = vrot.lane.b32.xlu0 %v1068_v49, %s1655_s7  ;;  %v1071_v51 = vrot.slane %v1068_v49, 6 }
 0xf30   :  { %v1113_v0 = vpop.permute.xlu0 %1112 }
 0xf31   :  { %1072 = vrot.lane.b32.xlu1 %v1071_v51, %s1655_s7  ;;  %v1119_v6 = vsel %vm1075_vm11, %v1113_v0, %v1117_v62 }
 0xf32   :  { %v1135_v27 = vsel %vm1130_vm14, %v1134_v19, %v1119_v6 }
 0xf35   :  { %1124 = vrot.lane.b32.xlu1 %v1123_v52, %s1655_s7 }
 0xfa1   :  { %v1121_v21 = vpop.permute.xlu0 %1120 }
 0xfa3   :  { %v1073_v2 = vpop.permute.xlu1 %1072 }
 0xfa4   :  { %v1076_v13 = vsel %vm1075_vm11, %v1812_v15, %v1073_v2 }
 0xfa5   :  { %v1129_v7 = vsel %vm1128_vm12, %v1076_v13, %v1084_v3 }
 0xfa6   :  { %v1131_v17 = vsel %vm1130_vm14, %v1129_v7, %v1092_v5 }
 0xfa7   :  { %v1125_v23 = vpop.permute.xlu1 %1124  ;;  %v1133_v25 = vsel %vm1132_vm13, %v1131_v17, %v1100_v12 }
 0xfa8   :  { %v1127_v15 = vsel %vm1075_vm11, %v1121_v21, %v1125_v23  ;;  %1451 = vmatprep.mubr.msk.f32.mxu0 %vm204_vm0, %v1133_v25 }
 0xfa9   :  { %v1136_v29 = vsel %vm1132_vm13, %v1135_v27, %v1127_v15 }
 0xfaa   :  { %1452 = vmatmul.mubr.msk.f32.vlgmr.msra.gmra.mxu0 %vm204_vm0, %v1136_v29  ;;  %vm1354_vm0 = vcmask 64512  }
0x106a   :  { %v1453_v39 = vpop.f32.mrf.mxu0 }
0x106b   :  { %v1233_v9 = vadd.f32 %v1453_v39, %v1413_v37 }
0x106c   :  { %v1227_v11 = vpop.f32.mrf.mxu0 }
0x106d   :  { %v1228_v14 = vadd.f32 %v1413_v37, %v1227_v11  ;;  %v1237_v18 = vmax.f32 %v1233_v9, 0.0 }
0x106f   :  { %v1236_v16 = vmax.f32 %v1228_v14, 0.0 }
0x1071   :  { %1462 = vmatprep.mubr.msk.f32.mxu1 %vm1075_vm11, %v1236_v16 }
0x1072   :  { %1463 = vmatmul.mubr.msk.f32.vlgmr.msra.gmra.mxu1 %vm1075_vm11, %v1237_v18 }
0x1132   :  { %v1464_v41 = vpop.f32.mrf.mxu1 }
0x1133   :  { %v1320_v22 = vadd.f32 %v1464_v41, %v1416_v20 }
0x1134   :  { %v1314_v24 = vpop.f32.mrf.mxu1 }
0x1135   :  { %v1315_v26 = vadd.f32 %v1416_v20, %v1314_v24  ;;  %1337 = vrot.lane.b32.xlu1 %v1320_v22, %s1648_s19  ;;  %v1340_v28 = vrot.slane %v1320_v22, 2  ;;  %v1344_v50 = vrot.slane %v1320_v22, 4  ;;  %v1348_v60 = vrot.slane %v1320_v22, 6 }
0x1137   :  { %1341 = vrot.lane.b32.xlu0 %v1340_v28, %s1656_s0  ;;  %v1328_v30 = vrot.slane %v1315_v26, 4  ;;  %v1324_v32 = vrot.slane %v1315_v26, 2  ;;  %v1332_v34 = vrot.slane %v1315_v26, 6 }
0x1139   :  { %1329 = vrot.lane.b32.xlu1 %v1328_v30, %s1651_s26 }
0x113b   :  { %1325 = vrot.lane.b32.xlu0 %v1324_v32, %s1657_s9 }
0x113d   :  { %1345 = vrot.lane.b32.xlu1 %v1344_v50, %s1658_s10 }
0x113f   :  { %1333 = vrot.lane.b32.xlu0 %v1332_v34, %s1659_s11 }
0x1143   :  { %1349 = vrot.lane.b32.xlu0 %v1348_v60, %s1660_s12 }
0x11a7   :  { %v1338_v36 = vpop.permute.xlu1 %1337 }
0x11a9   :  { %v1342_v56 = vpop.permute.xlu0 %1341 }
0x11ab   :  { %v1330_v38 = vpop.permute.xlu1 %1329 }
0x11ad   :  { %v1326_v33 = vpop.permute.xlu0 %1325 }
0x11ae   :  { %v1353_v40 = vsel %vm1352_vm15, %v1315_v26, %v1326_v33 }
0x11af   :  { %v1355_v43 = vsel %vm1354_vm0, %v1353_v40, %v1330_v38  ;;  %v1346_v46 = vpop.permute.xlu1 %1345 }
0x11b1   :  { %v1334_v44 = vpop.permute.xlu0 %1333 }
0x11b2   :  { %v1357_v45 = vsel %vm1356_vm1, %v1355_v43, %v1334_v44 }
0x11b3   :  { %v1359_v63 = vsel %vm1358_vm2, %v1357_v45, %v1338_v36 }
0x11b4   :  { %v1361_v47 = vsel %vm1360_vm3, %v1359_v63, %v1342_v56 }
0x11b5   :  { %v1363_v48 = vsel %vm1362_vm4, %v1361_v47, %v1346_v46  ;;  %v1350_v49 = vpop.permute.xlu0 %1349 }
0x11b6   :  { %v1365_v51 = vsel %vm1364_vm5, %v1363_v48, %v1350_v49 }
0x11b7   :  { %1367 = vst.msk [vmem:[#allocation7] sm:$0x3] %vm1366_vm6, %v1365_v51 }
0x11b8   :  { %1631 = shalt.err (!%p1628_p0)
}
0x11b9   :  { %1377 = dma.vmem_to_hbm [thread:$0]  %s1375_s14, 32, %s2013_s4, [#allocation4]  }
0x11ba   :  { %1644 = dma.done.wait [#allocation4], 32  }
0x11bb   :  { %1645 = vsyncadd [#allocation4], 4294967264 }
0x11bc   :  { %1381 = vsyncpa [#allocation3], 1 }
0x11bd   :  { %1382 = vsyncpa [#allocation6], 1 }
0x11be   :  { %1383 = vsyncpa [#allocation4], 1 }

</bundles_post_ra>
